<compile_context>
chip_gen: v5e
topology: v5e:2x2
jax: 0.10.0
libtpu: 0.0.40
codegen_flags: <defaults>
</compile_context>

<pallas_src>
import functools

import jax
import jax.numpy as jnp
import numpy as np
from jax import lax
from jax.experimental import pallas as pl
from jax.experimental.pallas import tpu as pltpu

EPS = 1e-5


# -----------------------------------------------------------------------------
# Static boundary masks for the 9 taps of a 3x3 "same" conv in flat (C, M) layout.
# mask[t, 0, m] = 1 iff pixel m shifted by tap t stays inside its own image.
# -----------------------------------------------------------------------------
@functools.lru_cache(maxsize=None)
def _boundary_masks(n, h, w):
    M = n * h * w
    m_idx = np.arange(M)
    rem = m_idx % (h * w)
    row = rem // w
    col = rem % w
    masks = np.empty((9, 1, M), np.float32)
    for dy in range(3):
        for dx in range(3):
            ro = row + (dy - 1)
            co = col + (dx - 1)
            valid = (ro >= 0) & (ro < h) & (co >= 0) & (co < w)
            masks[dy * 3 + dx, 0, :] = valid.astype(np.float32)
    return masks


# -----------------------------------------------------------------------------
# Fused kernel.
#   x_ref    : (Cin, M)     input, channel-major flat layout, M = N*H*W on lanes
#   g1,b1    : (Cin, 1)     bn1 gamma/beta (column vectors, broadcast along lanes)
#   w1_ref   : (C1, Cin)    1x1 conv weight (PyTorch OIHW squeezed)
#   g2,b2    : (C1, 1)      bn2 gamma/beta
#   w2_ref   : (9, G, C1)   3x3 conv weight per tap t = dy*3 + dx
#   mask_ref : (9, 1, M)    precomputed boundary masks per tap
#   o_ref    : (G+Cin, M)   [conv2_out ; x]  (pre-concatenated output)
# -----------------------------------------------------------------------------
def _bottleneck_kernel(x_ref, g1_ref, b1_ref, w1_ref, g2_ref, b2_ref, w2_ref,
                       mask_ref, o_ref, *, w_img):
    Cin, M = x_ref.shape
    G = w2_ref.shape[1]
    inv_m = 1.0 / M

    x = x_ref[...]                                            # (Cin, M) f32

    # ---- BN1 (batch stats, biased var) + ReLU -------------------------------
    mean1 = jnp.sum(x, axis=1, keepdims=True) * inv_m         # (Cin, 1)
    xc = x - mean1
    var1 = jnp.sum(xc * xc, axis=1, keepdims=True) * inv_m
    s1 = g1_ref[...] * lax.rsqrt(var1 + EPS)
    a1 = jnp.maximum(xc * s1 + b1_ref[...], 0.0)              # (Cin, M)

    # ---- 1x1 conv: (C1, Cin) @ (Cin, M) -> (C1, M), lane-dense --------------
    hmat = jnp.dot(w1_ref[...], a1, preferred_element_type=jnp.float32)

    # ---- BN2 + ReLU ----------------------------------------------------------
    mean2 = jnp.sum(hmat, axis=1, keepdims=True) * inv_m      # (C1, 1)
    hc = hmat - mean2
    var2 = jnp.sum(hc * hc, axis=1, keepdims=True) * inv_m
    s2 = g2_ref[...] * lax.rsqrt(var2 + EPS)
    a2 = jnp.maximum(hc * s2 + b2_ref[...], 0.0)              # (C1, M)

    # ---- 3x3 conv (padding=1) as 9 accumulating taps -------------------------
    # Tap (dy, dx) needs a2[c, flat(m) + s] with s = (dy-1)*W + (dx-1): built as a
    # lane rotation (pltpu.roll, XLU) times a precomputed boundary mask.  Each tap
    # immediately feeds a small (G, C1) @ (C1, M) dot that accumulates into y, so
    # no (9*C1, M) patch matrix is ever materialized.
    y = None
    for dy in range(3):
        for dx in range(3):
            t = dy * 3 + dx
            s = (dy - 1) * w_img + (dx - 1)
            rolled = a2 if s == 0 else pltpu.roll(a2, shift=(-s) % M, axis=1)
            if dy == 1 and dx == 1:
                patch = rolled                                # center tap: always valid
            else:
                patch = rolled * mask_ref[t]                  # (1, M) mask broadcast
            contrib = jnp.dot(w2_ref[t], patch,
                              preferred_element_type=jnp.float32)   # (G, M)
            y = contrib if y is None else y + contrib

    # ---- torch.cat([conv2_out, x], dim=1): direct slice stores ---------------
    o_ref[pl.ds(0, G), :] = y.astype(o_ref.dtype)
    o_ref[pl.ds(G, Cin), :] = x.astype(o_ref.dtype)


# -----------------------------------------------------------------------------
# Wrapper: NCHW in / NCHW out (matches the PyTorch module interface).
# -----------------------------------------------------------------------------
@jax.jit
def bottleneck_forward(x_nchw, params):
    N, Cin, H, W = x_nchw.shape
    C1 = params["w1"].shape[0]
    G = params["w2"].shape[0]
    M = N * H * W

    # channel-major flat layout: x_cm[c, n*H*W + i*W + j] = x[n, c, i, j]
    x_cm = jnp.transpose(x_nchw, (1, 0, 2, 3)).reshape(Cin, M).astype(jnp.float32)

    w1 = params["w1"].astype(jnp.float32)                                   # (C1, Cin)
    # OIHW (G, C1, 3, 3) -> (3, 3, G, C1) -> (9, G, C1); tap t = dy*3 + dx
    w2t = jnp.transpose(params["w2"], (2, 3, 0, 1)).reshape(9, G, C1).astype(jnp.float32)
    g1 = params["gamma1"].reshape(Cin, 1).astype(jnp.float32)
    b1 = params["beta1"].reshape(Cin, 1).astype(jnp.float32)
    g2 = params["gamma2"].reshape(C1, 1).astype(jnp.float32)
    b2 = params["beta2"].reshape(C1, 1).astype(jnp.float32)

    # Static masks (baked as a constant at trace time, keyed on (N, H, W)).
    masks = jnp.asarray(_boundary_masks(N, H, W))             # (9, 1, M)

    kernel = functools.partial(_bottleneck_kernel, w_img=W)

    out_cm = pl.pallas_call(
        kernel,
        out_shape=jax.ShapeDtypeStruct((G + Cin, M), jnp.float32),
        grid_spec=pltpu.PrefetchScalarGridSpec(
            num_scalar_prefetch=0,
            grid=(1,),
            in_specs=[
                pl.BlockSpec((Cin, M), lambda i: (0, 0)),
                pl.BlockSpec((Cin, 1), lambda i: (0, 0)),
                pl.BlockSpec((Cin, 1), lambda i: (0, 0)),
                pl.BlockSpec((C1, Cin), lambda i: (0, 0)),
                pl.BlockSpec((C1, 1), lambda i: (0, 0)),
                pl.BlockSpec((C1, 1), lambda i: (0, 0)),
                pl.BlockSpec((9, G, C1), lambda i: (0, 0, 0)),
                pl.BlockSpec((9, 1, M), lambda i: (0, 0, 0)),
            ],
            out_specs=pl.BlockSpec((G + Cin, M), lambda i: (0, 0)),
        ),
        compiler_params=pltpu.CompilerParams(dimension_semantics=("arbitrary",)),
    )(x_cm, g1, b1, w1, g2, b2, w2t, masks)

    out = out_cm.reshape(G + Cin, N, H, W)
    return jnp.transpose(out, (1, 0, 2, 3))                   # NCHW


# -----------------------------------------------------------------------------
# Pure-JAX reference (same math) for verification.
# -----------------------------------------------------------------------------
def reference_forward(x_nchw, params):
    x = jnp.transpose(x_nchw, (0, 2, 3, 1)).astype(jnp.float32)   # NHWC
    C1, Cin = params["w1"].shape
    G = params["w2"].shape[0]

    def bn(v, g, b):
        m = v.mean(axis=(0, 1, 2))
        var = ((v - m) ** 2).mean(axis=(0, 1, 2))
        return (v - m) * lax.rsqrt(var + EPS) * g + b

    a1 = jax.nn.relu(bn(x, params["gamma1"], params["beta1"]))
    w1_hwio = params["w1"].T.reshape(1, 1, Cin, C1)
    h = lax.conv_general_dilated(a1, w1_hwio, (1, 1), "VALID",
                                 dimension_numbers=("NHWC", "HWIO", "NHWC"))
    a2 = jax.nn.relu(bn(h, params["gamma2"], params["beta2"]))
    w2_hwio = jnp.transpose(params["w2"], (2, 3, 1, 0))           # OIHW -> HWIO
    y = lax.conv_general_dilated(a2, w2_hwio, (1, 1), "SAME",
                                 dimension_numbers=("NHWC", "HWIO", "NHWC"))
    out = jnp.concatenate([y, x], axis=-1)
    return jnp.transpose(out, (0, 3, 1, 2))


if __name__ == "__main__":
    # Bottleneck(in_planes=4, growth_rate=8) on a (2, 4, 16, 16) input.
    N, Cin, H, W = 2, 4, 16, 16
    growth = 8
    C1 = 4 * growth

    key = jax.random.PRNGKey(0)
    k = jax.random.split(key, 7)

    x = jax.random.normal(k[0], (N, Cin, H, W), dtype=jnp.float32)

    params = {
        # BatchNorm2d(in_planes)
        "gamma1": 1.0 + 0.1 * jax.random.normal(k[1], (Cin,), jnp.float32),
        "beta1": 0.1 * jax.random.normal(k[2], (Cin,), jnp.float32),
        # Conv2d(in_planes, 4*growth, 1, bias=False): OIHW squeezed -> (C1, Cin)
        "w1": jax.random.normal(k[3], (C1, Cin), jnp.float32) / np.sqrt(Cin),
        # BatchNorm2d(4*growth)
        "gamma2": 1.0 + 0.1 * jax.random.normal(k[4], (C1,), jnp.float32),
        "beta2": 0.1 * jax.random.normal(k[5], (C1,), jnp.float32),
        # Conv2d(4*growth, growth, 3, padding=1, bias=False): OIHW (G, C1, 3, 3)
        "w2": jax.random.normal(k[6], (growth, C1, 3, 3), jnp.float32) / np.sqrt(9 * C1),
    }

    out = jax.block_until_ready(bottleneck_forward(x, params))
    ref = jax.block_until_ready(reference_forward(x, params))

    assert out.shape == (N, growth + Cin, H, W), out.shape
    np.testing.assert_allclose(np.asarray(out), np.asarray(ref), rtol=2e-4, atol=2e-4)

    print("KERNEL_OK")
</pallas_src>

<mosaic_0001>
module attributes {stable_mosaic.version = 11 : i64} {
  func.func @_bottleneck_kernel(%arg0: i32, %arg1: memref<4x512xf32, #tpu.memory_space<vmem>>, %arg2: memref<4x1xf32, #tpu.memory_space<vmem>>, %arg3: memref<4x1xf32, #tpu.memory_space<vmem>>, %arg4: memref<32x4xf32, #tpu.memory_space<vmem>>, %arg5: memref<32x1xf32, #tpu.memory_space<vmem>>, %arg6: memref<32x1xf32, #tpu.memory_space<vmem>>, %arg7: memref<9x8x32xf32, #tpu.memory_space<vmem>>, %arg8: memref<9x1x512xf32, #tpu.memory_space<vmem>>, %arg9: memref<12x512xf32, #tpu.memory_space<vmem>>) attributes {dimension_semantics = [#tpu.dimension_semantics<arbitrary>], iteration_bounds = array<i64: 1>, scalar_prefetch = 0 : i64, scratch_operands = 0 : i64, tpu.core_type = #tpu.core_type<tc>, window_params = [{pipeline_mode = #tpu.pipeline_mode<synchronous>, transform_indices = @transform_0, window_bounds = array<i64: 4, 512>}, {pipeline_mode = #tpu.pipeline_mode<synchronous>, transform_indices = @transform_1, window_bounds = array<i64: 4, 1>}, {pipeline_mode = #tpu.pipeline_mode<synchronous>, transform_indices = @transform_2, window_bounds = array<i64: 4, 1>}, {pipeline_mode = #tpu.pipeline_mode<synchronous>, transform_indices = @transform_3, window_bounds = array<i64: 32, 4>}, {pipeline_mode = #tpu.pipeline_mode<synchronous>, transform_indices = @transform_4, window_bounds = array<i64: 32, 1>}, {pipeline_mode = #tpu.pipeline_mode<synchronous>, transform_indices = @transform_5, window_bounds = array<i64: 32, 1>}, {pipeline_mode = #tpu.pipeline_mode<synchronous>, transform_indices = @transform_6, window_bounds = array<i64: 9, 8, 32>}, {pipeline_mode = #tpu.pipeline_mode<synchronous>, transform_indices = @transform_7, window_bounds = array<i64: 9, 1, 512>}, {pipeline_mode = #tpu.pipeline_mode<synchronous>, transform_indices = @transform_8, window_bounds = array<i64: 12, 512>}]} {
    %c0 = arith.constant 0 : index
    %c0_0 = arith.constant 0 : index
    %0 = vector.load %arg1[%c0, %c0_0] : memref<4x512xf32, #tpu.memory_space<vmem>>, vector<4x512xf32>
    %cst = arith.constant dense<0.000000e+00> : vector<4xf32>
    %1 = vector.multi_reduction <add>, %0, %cst [1] : vector<4x512xf32> to vector<4xf32>
    %2 = vector.shape_cast %1 : vector<4xf32> to vector<4x1xf32>
    %cst_1 = arith.constant 0.001953125 : f32
    %3 = vector.broadcast %cst_1 : f32 to vector<4x1xf32>
    %4 = arith.mulf %2, %3 : vector<4x1xf32>
    %5 = vector.broadcast %4 : vector<4x1xf32> to vector<4x512xf32>
    %6 = arith.subf %0, %5 : vector<4x512xf32>
    %7 = arith.mulf %6, %6 : vector<4x512xf32>
    %cst_2 = arith.constant dense<0.000000e+00> : vector<4xf32>
    %8 = vector.multi_reduction <add>, %7, %cst_2 [1] : vector<4x512xf32> to vector<4xf32>
    %9 = vector.shape_cast %8 : vector<4xf32> to vector<4x1xf32>
    %cst_3 = arith.constant 0.001953125 : f32
    %10 = vector.broadcast %cst_3 : f32 to vector<4x1xf32>
    %11 = arith.mulf %9, %10 : vector<4x1xf32>
    %c0_4 = arith.constant 0 : index
    %c0_5 = arith.constant 0 : index
    %12 = vector.load %arg2[%c0_4, %c0_5] : memref<4x1xf32, #tpu.memory_space<vmem>>, vector<4x1xf32>
    %cst_6 = arith.constant 9.99999974E-6 : f32
    %13 = vector.broadcast %cst_6 : f32 to vector<4x1xf32>
    %14 = arith.addf %11, %13 : vector<4x1xf32>
    %15 = math.rsqrt %14 : vector<4x1xf32>
    %16 = arith.mulf %12, %15 : vector<4x1xf32>
    %17 = vector.broadcast %16 : vector<4x1xf32> to vector<4x512xf32>
    %18 = arith.mulf %6, %17 : vector<4x512xf32>
    %c0_7 = arith.constant 0 : index
    %c0_8 = arith.constant 0 : index
    %19 = vector.load %arg3[%c0_7, %c0_8] : memref<4x1xf32, #tpu.memory_space<vmem>>, vector<4x1xf32>
    %20 = vector.broadcast %19 : vector<4x1xf32> to vector<4x512xf32>
    %21 = arith.addf %18, %20 : vector<4x512xf32>
    %cst_9 = arith.constant 0.000000e+00 : f32
    %22 = vector.broadcast %cst_9 : f32 to vector<4x512xf32>
    %23 = arith.maximumf %21, %22 : vector<4x512xf32>
    %c0_10 = arith.constant 0 : index
    %c0_11 = arith.constant 0 : index
    %24 = vector.load %arg4[%c0_10, %c0_11] : memref<32x4xf32, #tpu.memory_space<vmem>>, vector<32x4xf32>
    %cst_12 = arith.constant dense<0.000000e+00> : vector<32x512xf32>
    %25 = tpu.matmul %24, %23, %cst_12 {dimension_numbers = #tpu.dot_dimension_numbers<[1], [0], [0], [1], [0, 0, 1, 1], [], []>} : vector<32x4xf32>, vector<4x512xf32>, vector<32x512xf32> -> vector<32x512xf32>
    %cst_13 = arith.constant dense<0.000000e+00> : vector<32xf32>
    %26 = vector.multi_reduction <add>, %25, %cst_13 [1] : vector<32x512xf32> to vector<32xf32>
    %27 = vector.shape_cast %26 : vector<32xf32> to vector<32x1xf32>
    %cst_14 = arith.constant 0.001953125 : f32
    %28 = vector.broadcast %cst_14 : f32 to vector<32x1xf32>
    %29 = arith.mulf %27, %28 : vector<32x1xf32>
    %30 = vector.broadcast %29 : vector<32x1xf32> to vector<32x512xf32>
    %31 = arith.subf %25, %30 : vector<32x512xf32>
    %32 = arith.mulf %31, %31 : vector<32x512xf32>
    %cst_15 = arith.constant dense<0.000000e+00> : vector<32xf32>
    %33 = vector.multi_reduction <add>, %32, %cst_15 [1] : vector<32x512xf32> to vector<32xf32>
    %34 = vector.shape_cast %33 : vector<32xf32> to vector<32x1xf32>
    %cst_16 = arith.constant 0.001953125 : f32
    %35 = vector.broadcast %cst_16 : f32 to vector<32x1xf32>
    %36 = arith.mulf %34, %35 : vector<32x1xf32>
    %c0_17 = arith.constant 0 : index
    %c0_18 = arith.constant 0 : index
    %37 = vector.load %arg5[%c0_17, %c0_18] : memref<32x1xf32, #tpu.memory_space<vmem>>, vector<32x1xf32>
    %cst_19 = arith.constant 9.99999974E-6 : f32
    %38 = vector.broadcast %cst_19 : f32 to vector<32x1xf32>
    %39 = arith.addf %36, %38 : vector<32x1xf32>
    %40 = math.rsqrt %39 : vector<32x1xf32>
    %41 = arith.mulf %37, %40 : vector<32x1xf32>
    %42 = vector.broadcast %41 : vector<32x1xf32> to vector<32x512xf32>
    %43 = arith.mulf %31, %42 : vector<32x512xf32>
    %c0_20 = arith.constant 0 : index
    %c0_21 = arith.constant 0 : index
    %44 = vector.load %arg6[%c0_20, %c0_21] : memref<32x1xf32, #tpu.memory_space<vmem>>, vector<32x1xf32>
    %45 = vector.broadcast %44 : vector<32x1xf32> to vector<32x512xf32>
    %46 = arith.addf %43, %45 : vector<32x512xf32>
    %cst_22 = arith.constant 0.000000e+00 : f32
    %47 = vector.broadcast %cst_22 : f32 to vector<32x512xf32>
    %48 = arith.maximumf %46, %47 : vector<32x512xf32>
    %c17_i32 = arith.constant 17 : i32
    %49 = tpu.dynamic_rotate %48 by %c17_i32 dim 1 : vector<32x512xf32>, i32 -> vector<32x512xf32>
    %c0_23 = arith.constant 0 : index
    %c0_24 = arith.constant 0 : index
    %c0_25 = arith.constant 0 : index
    %50 = vector.load %arg8[%c0_23, %c0_24, %c0_25] : memref<9x1x512xf32, #tpu.memory_space<vmem>>, vector<1x1x512xf32>
    %51 = vector.shape_cast %50 : vector<1x1x512xf32> to vector<1x512xf32>
    %52 = vector.broadcast %51 : vector<1x512xf32> to vector<32x512xf32>
    %53 = arith.mulf %49, %52 : vector<32x512xf32>
    %c0_26 = arith.constant 0 : index
    %c0_27 = arith.constant 0 : index
    %c0_28 = arith.constant 0 : index
    %54 = vector.load %arg7[%c0_26, %c0_27, %c0_28] : memref<9x8x32xf32, #tpu.memory_space<vmem>>, vector<1x8x32xf32>
    %55 = vector.shape_cast %54 : vector<1x8x32xf32> to vector<8x32xf32>
    %cst_29 = arith.constant dense<0.000000e+00> : vector<8x512xf32>
    %56 = tpu.matmul %55, %53, %cst_29 {dimension_numbers = #tpu.dot_dimension_numbers<[1], [0], [0], [1], [0, 0, 1, 1], [], []>} : vector<8x32xf32>, vector<32x512xf32>, vector<8x512xf32> -> vector<8x512xf32>
    %c16_i32 = arith.constant 16 : i32
    %57 = tpu.dynamic_rotate %48 by %c16_i32 dim 1 : vector<32x512xf32>, i32 -> vector<32x512xf32>
    %c1 = arith.constant 1 : index
    %c0_30 = arith.constant 0 : index
    %c0_31 = arith.constant 0 : index
    %58 = vector.load %arg8[%c1, %c0_30, %c0_31] : memref<9x1x512xf32, #tpu.memory_space<vmem>>, vector<1x1x512xf32>
    %59 = vector.shape_cast %58 : vector<1x1x512xf32> to vector<1x512xf32>
    %60 = vector.broadcast %59 : vector<1x512xf32> to vector<32x512xf32>
    %61 = arith.mulf %57, %60 : vector<32x512xf32>
    %c1_32 = arith.constant 1 : index
    %c0_33 = arith.constant 0 : index
    %c0_34 = arith.constant 0 : index
    %62 = vector.load %arg7[%c1_32, %c0_33, %c0_34] : memref<9x8x32xf32, #tpu.memory_space<vmem>>, vector<1x8x32xf32>
    %63 = vector.shape_cast %62 : vector<1x8x32xf32> to vector<8x32xf32>
    %cst_35 = arith.constant dense<0.000000e+00> : vector<8x512xf32>
    %64 = tpu.matmul %63, %61, %cst_35 {dimension_numbers = #tpu.dot_dimension_numbers<[1], [0], [0], [1], [0, 0, 1, 1], [], []>} : vector<8x32xf32>, vector<32x512xf32>, vector<8x512xf32> -> vector<8x512xf32>
    %65 = arith.addf %56, %64 : vector<8x512xf32>
    %c15_i32 = arith.constant 15 : i32
    %66 = tpu.dynamic_rotate %48 by %c15_i32 dim 1 : vector<32x512xf32>, i32 -> vector<32x512xf32>
    %c2 = arith.constant 2 : index
    %c0_36 = arith.constant 0 : index
    %c0_37 = arith.constant 0 : index
    %67 = vector.load %arg8[%c2, %c0_36, %c0_37] : memref<9x1x512xf32, #tpu.memory_space<vmem>>, vector<1x1x512xf32>
    %68 = vector.shape_cast %67 : vector<1x1x512xf32> to vector<1x512xf32>
    %69 = vector.broadcast %68 : vector<1x512xf32> to vector<32x512xf32>
    %70 = arith.mulf %66, %69 : vector<32x512xf32>
    %c2_38 = arith.constant 2 : index
    %c0_39 = arith.constant 0 : index
    %c0_40 = arith.constant 0 : index
    %71 = vector.load %arg7[%c2_38, %c0_39, %c0_40] : memref<9x8x32xf32, #tpu.memory_space<vmem>>, vector<1x8x32xf32>
    %72 = vector.shape_cast %71 : vector<1x8x32xf32> to vector<8x32xf32>
    %cst_41 = arith.constant dense<0.000000e+00> : vector<8x512xf32>
    %73 = tpu.matmul %72, %70, %cst_41 {dimension_numbers = #tpu.dot_dimension_numbers<[1], [0], [0], [1], [0, 0, 1, 1], [], []>} : vector<8x32xf32>, vector<32x512xf32>, vector<8x512xf32> -> vector<8x512xf32>
    %74 = arith.addf %65, %73 : vector<8x512xf32>
    %c1_i32 = arith.constant 1 : i32
    %75 = tpu.dynamic_rotate %48 by %c1_i32 dim 1 : vector<32x512xf32>, i32 -> vector<32x512xf32>
    %c3 = arith.constant 3 : index
    %c0_42 = arith.constant 0 : index
    %c0_43 = arith.constant 0 : index
    %76 = vector.load %arg8[%c3, %c0_42, %c0_43] : memref<9x1x512xf32, #tpu.memory_space<vmem>>, vector<1x1x512xf32>
    %77 = vector.shape_cast %76 : vector<1x1x512xf32> to vector<1x512xf32>
    %78 = vector.broadcast %77 : vector<1x512xf32> to vector<32x512xf32>
    %79 = arith.mulf %75, %78 : vector<32x512xf32>
    %c3_44 = arith.constant 3 : index
    %c0_45 = arith.constant 0 : index
    %c0_46 = arith.constant 0 : index
    %80 = vector.load %arg7[%c3_44, %c0_45, %c0_46] : memref<9x8x32xf32, #tpu.memory_space<vmem>>, vector<1x8x32xf32>
    %81 = vector.shape_cast %80 : vector<1x8x32xf32> to vector<8x32xf32>
    %cst_47 = arith.constant dense<0.000000e+00> : vector<8x512xf32>
    %82 = tpu.matmul %81, %79, %cst_47 {dimension_numbers = #tpu.dot_dimension_numbers<[1], [0], [0], [1], [0, 0, 1, 1], [], []>} : vector<8x32xf32>, vector<32x512xf32>, vector<8x512xf32> -> vector<8x512xf32>
    %83 = arith.addf %74, %82 : vector<8x512xf32>
    %c4 = arith.constant 4 : index
    %c0_48 = arith.constant 0 : index
    %c0_49 = arith.constant 0 : index
    %84 = vector.load %arg7[%c4, %c0_48, %c0_49] : memref<9x8x32xf32, #tpu.memory_space<vmem>>, vector<1x8x32xf32>
    %85 = vector.shape_cast %84 : vector<1x8x32xf32> to vector<8x32xf32>
    %cst_50 = arith.constant dense<0.000000e+00> : vector<8x512xf32>
    %86 = tpu.matmul %85, %48, %cst_50 {dimension_numbers = #tpu.dot_dimension_numbers<[1], [0], [0], [1], [0, 0, 1, 1], [], []>} : vector<8x32xf32>, vector<32x512xf32>, vector<8x512xf32> -> vector<8x512xf32>
    %87 = arith.addf %83, %86 : vector<8x512xf32>
    %c511_i32 = arith.constant 511 : i32
    %88 = tpu.dynamic_rotate %48 by %c511_i32 dim 1 : vector<32x512xf32>, i32 -> vector<32x512xf32>
    %c5 = arith.constant 5 : index
    %c0_51 = arith.constant 0 : index
    %c0_52 = arith.constant 0 : index
    %89 = vector.load %arg8[%c5, %c0_51, %c0_52] : memref<9x1x512xf32, #tpu.memory_space<vmem>>, vector<1x1x512xf32>
    %90 = vector.shape_cast %89 : vector<1x1x512xf32> to vector<1x512xf32>
    %91 = vector.broadcast %90 : vector<1x512xf32> to vector<32x512xf32>
    %92 = arith.mulf %88, %91 : vector<32x512xf32>
    %c5_53 = arith.constant 5 : index
    %c0_54 = arith.constant 0 : index
    %c0_55 = arith.constant 0 : index
    %93 = vector.load %arg7[%c5_53, %c0_54, %c0_55] : memref<9x8x32xf32, #tpu.memory_space<vmem>>, vector<1x8x32xf32>
    %94 = vector.shape_cast %93 : vector<1x8x32xf32> to vector<8x32xf32>
    %cst_56 = arith.constant dense<0.000000e+00> : vector<8x512xf32>
    %95 = tpu.matmul %94, %92, %cst_56 {dimension_numbers = #tpu.dot_dimension_numbers<[1], [0], [0], [1], [0, 0, 1, 1], [], []>} : vector<8x32xf32>, vector<32x512xf32>, vector<8x512xf32> -> vector<8x512xf32>
    %96 = arith.addf %87, %95 : vector<8x512xf32>
    %c497_i32 = arith.constant 497 : i32
    %97 = tpu.dynamic_rotate %48 by %c497_i32 dim 1 : vector<32x512xf32>, i32 -> vector<32x512xf32>
    %c6 = arith.constant 6 : index
    %c0_57 = arith.constant 0 : index
    %c0_58 = arith.constant 0 : index
    %98 = vector.load %arg8[%c6, %c0_57, %c0_58] : memref<9x1x512xf32, #tpu.memory_space<vmem>>, vector<1x1x512xf32>
    %99 = vector.shape_cast %98 : vector<1x1x512xf32> to vector<1x512xf32>
    %100 = vector.broadcast %99 : vector<1x512xf32> to vector<32x512xf32>
    %101 = arith.mulf %97, %100 : vector<32x512xf32>
    %c6_59 = arith.constant 6 : index
    %c0_60 = arith.constant 0 : index
    %c0_61 = arith.constant 0 : index
    %102 = vector.load %arg7[%c6_59, %c0_60, %c0_61] : memref<9x8x32xf32, #tpu.memory_space<vmem>>, vector<1x8x32xf32>
    %103 = vector.shape_cast %102 : vector<1x8x32xf32> to vector<8x32xf32>
    %cst_62 = arith.constant dense<0.000000e+00> : vector<8x512xf32>
    %104 = tpu.matmul %103, %101, %cst_62 {dimension_numbers = #tpu.dot_dimension_numbers<[1], [0], [0], [1], [0, 0, 1, 1], [], []>} : vector<8x32xf32>, vector<32x512xf32>, vector<8x512xf32> -> vector<8x512xf32>
    %105 = arith.addf %96, %104 : vector<8x512xf32>
    %c496_i32 = arith.constant 496 : i32
    %106 = tpu.dynamic_rotate %48 by %c496_i32 dim 1 : vector<32x512xf32>, i32 -> vector<32x512xf32>
    %c7 = arith.constant 7 : index
    %c0_63 = arith.constant 0 : index
    %c0_64 = arith.constant 0 : index
    %107 = vector.load %arg8[%c7, %c0_63, %c0_64] : memref<9x1x512xf32, #tpu.memory_space<vmem>>, vector<1x1x512xf32>
    %108 = vector.shape_cast %107 : vector<1x1x512xf32> to vector<1x512xf32>
    %109 = vector.broadcast %108 : vector<1x512xf32> to vector<32x512xf32>
    %110 = arith.mulf %106, %109 : vector<32x512xf32>
    %c7_65 = arith.constant 7 : index
    %c0_66 = arith.constant 0 : index
    %c0_67 = arith.constant 0 : index
    %111 = vector.load %arg7[%c7_65, %c0_66, %c0_67] : memref<9x8x32xf32, #tpu.memory_space<vmem>>, vector<1x8x32xf32>
    %112 = vector.shape_cast %111 : vector<1x8x32xf32> to vector<8x32xf32>
    %cst_68 = arith.constant dense<0.000000e+00> : vector<8x512xf32>
    %113 = tpu.matmul %112, %110, %cst_68 {dimension_numbers = #tpu.dot_dimension_numbers<[1], [0], [0], [1], [0, 0, 1, 1], [], []>} : vector<8x32xf32>, vector<32x512xf32>, vector<8x512xf32> -> vector<8x512xf32>
    %114 = arith.addf %105, %113 : vector<8x512xf32>
    %c495_i32 = arith.constant 495 : i32
    %115 = tpu.dynamic_rotate %48 by %c495_i32 dim 1 : vector<32x512xf32>, i32 -> vector<32x512xf32>
    %c8 = arith.constant 8 : index
    %c0_69 = arith.constant 0 : index
    %c0_70 = arith.constant 0 : index
    %116 = vector.load %arg8[%c8, %c0_69, %c0_70] : memref<9x1x512xf32, #tpu.memory_space<vmem>>, vector<1x1x512xf32>
    %117 = vector.shape_cast %116 : vector<1x1x512xf32> to vector<1x512xf32>
    %118 = vector.broadcast %117 : vector<1x512xf32> to vector<32x512xf32>
    %119 = arith.mulf %115, %118 : vector<32x512xf32>
    %c8_71 = arith.constant 8 : index
    %c0_72 = arith.constant 0 : index
    %c0_73 = arith.constant 0 : index
    %120 = vector.load %arg7[%c8_71, %c0_72, %c0_73] : memref<9x8x32xf32, #tpu.memory_space<vmem>>, vector<1x8x32xf32>
    %121 = vector.shape_cast %120 : vector<1x8x32xf32> to vector<8x32xf32>
    %cst_74 = arith.constant dense<0.000000e+00> : vector<8x512xf32>
    %122 = tpu.matmul %121, %119, %cst_74 {dimension_numbers = #tpu.dot_dimension_numbers<[1], [0], [0], [1], [0, 0, 1, 1], [], []>} : vector<8x32xf32>, vector<32x512xf32>, vector<8x512xf32> -> vector<8x512xf32>
    %123 = arith.addf %114, %122 : vector<8x512xf32>
    %c0_75 = arith.constant 0 : index
    %c0_76 = arith.constant 0 : index
    %124 = vector.load %arg9[%c0_75, %c0_76] : memref<12x512xf32, #tpu.memory_space<vmem>>, vector<8x512xf32>
    tpu.vector_store %arg9[%c0_75, %c0_76], %123 {strides = array<i32>} : memref<12x512xf32, #tpu.memory_space<vmem>>, vector<8x512xf32>,
    %c8_77 = arith.constant 8 : index
    %c0_78 = arith.constant 0 : index
    %125 = vector.load %arg9[%c8_77, %c0_78] : memref<12x512xf32, #tpu.memory_space<vmem>>, vector<4x512xf32>
    tpu.vector_store %arg9[%c8_77, %c0_78], %0 {strides = array<i32>} : memref<12x512xf32, #tpu.memory_space<vmem>>, vector<4x512xf32>,
    return
  }
  func.func @transform_0(%arg0: i32) -> (i32, i32) {
    %c0_i32 = arith.constant 0 : i32
    %c0_i32_0 = arith.constant 0 : i32
    %c0_i32_1 = arith.constant 0 : i32
    return %c0_i32, %c0_i32_0 : i32, i32
  }
  func.func @transform_1(%arg0: i32) -> (i32, i32) {
    %c0_i32 = arith.constant 0 : i32
    %c0_i32_0 = arith.constant 0 : i32
    %c0_i32_1 = arith.constant 0 : i32
    return %c0_i32, %c0_i32_0 : i32, i32
  }
  func.func @transform_2(%arg0: i32) -> (i32, i32) {
    %c0_i32 = arith.constant 0 : i32
    %c0_i32_0 = arith.constant 0 : i32
    %c0_i32_1 = arith.constant 0 : i32
    return %c0_i32, %c0_i32_0 : i32, i32
  }
  func.func @transform_3(%arg0: i32) -> (i32, i32) {
    %c0_i32 = arith.constant 0 : i32
    %c0_i32_0 = arith.constant 0 : i32
    %c0_i32_1 = arith.constant 0 : i32
    return %c0_i32, %c0_i32_0 : i32, i32
  }
  func.func @transform_4(%arg0: i32) -> (i32, i32) {
    %c0_i32 = arith.constant 0 : i32
    %c0_i32_0 = arith.constant 0 : i32
    %c0_i32_1 = arith.constant 0 : i32
    return %c0_i32, %c0_i32_0 : i32, i32
  }
  func.func @transform_5(%arg0: i32) -> (i32, i32) {
    %c0_i32 = arith.constant 0 : i32
    %c0_i32_0 = arith.constant 0 : i32
    %c0_i32_1 = arith.constant 0 : i32
    return %c0_i32, %c0_i32_0 : i32, i32
  }
  func.func @transform_6(%arg0: i32) -> (i32, i32, i32) {
    %c0_i32 = arith.constant 0 : i32
    %c0_i32_0 = arith.constant 0 : i32
    %c0_i32_1 = arith.constant 0 : i32
    %c0_i32_2 = arith.constant 0 : i32
    return %c0_i32, %c0_i32_0, %c0_i32_1 : i32, i32, i32
  }
  func.func @transform_7(%arg0: i32) -> (i32, i32, i32) {
    %c0_i32 = arith.constant 0 : i32
    %c0_i32_0 = arith.constant 0 : i32
    %c0_i32_1 = arith.constant 0 : i32
    %c0_i32_2 = arith.constant 0 : i32
    return %c0_i32, %c0_i32_0, %c0_i32_1 : i32, i32, i32
  }
  func.func @transform_8(%arg0: i32) -> (i32, i32) {
    %c0_i32 = arith.constant 0 : i32
    %c0_i32_0 = arith.constant 0 : i32
    %c0_i32_1 = arith.constant 0 : i32
    return %c0_i32, %c0_i32_0 : i32, i32
  }
}

</mosaic_0001>

<bundles_post_ra>
// kernel: bottleneck_forward.1
= control target key start
LH: loop header
LB: loop body
LE: loop exit
PB: predicated region body
PF: predicated region fallthrough
CT: control target
= control target key end

     0   :  { %vm44_vm0 = vcmask 1043456   ;;  %v2019_v13 = vmov 839922192   ;;  %v2020_v34 = vmov 0   ;;  %vm139_vm4 = vcmask 31744   ;;  %s2022_s9 = smov 16   ;;  %s3305_s0 = inlined_call_operand.vmem [shape: f32[4,512], index: 0, kind: input, shape index: {}]   ;;  %s3306_s1 = inlined_call_operand.vmem [shape: f32[4,1], index: 1, kind: input, shape index: {}]   ;;  %s3307_s2 = inlined_call_operand.vmem [shape: f32[4,1], index: 2, kind: input, shape index: {}]   ;;  %s3308_s5 = inlined_call_operand.vmem [shape: f32[32,1], index: 5, kind: input, shape index: {}]   ;;  %s3309_s3 = inlined_call_operand.vmem [shape: f32[32,4], index: 3, kind: input, shape index: {}]   ;;  %s3310_s4 = inlined_call_operand.vmem [shape: f32[32,1], index: 4, kind: input, shape index: {}]   ;;  %s3311_s7 = inlined_call_operand.vmem [shape: f32[9,1,512], index: 7, kind: input, shape index: {}]   ;;  %s3312_s6 = inlined_call_operand.vmem [shape: f32[9,8,32], index: 6, kind: input, shape index: {}]   ;;  %s3313_s8 = inlined_call_operand.vmem [shape: f32[12,512], index: 8, kind: output, shape index: {}]  }
   0x1   :  { %v2077_v0 = vld [vmem:[%s3305_s0] sm:$0xff]  ;;  %v2082_v1 = vld [vmem:[%s3305_s0 + $0x8] sm:$0xff]  ;;  %v57_v14 = vunpack.c.l.s4 %v2019_v13  ;;  %2006 = vset.pattern.permute.xlu1 %v2020_v34  ;;  %2007 = vset.pattern.permute.xlu2 %v2020_v34  ;;  %v446_v59 = vld [vmem:[%s3308_s5 + $0x10] sm:$0xff]  ;;  %s2023_s10 = smov 15   ;;  %s2024_s11 = smov 1  }
   0x2   :  { %33 = vst [vmem:[#allocation1] ss:$2 sm:$0xff] %v2077_v0  ;;  %2008 = vset.pattern.permute.xlu0 %v2020_v34  ;;  %v88_v43 = vld [vmem:[%s3306_s1] sm:$0xf]  ;;  %s2025_s1 = smov 113   ;;  %s2026_s12 = smov 127  }
   0x3   :  { %35 = vst [vmem:[#allocation1 + $0x10] ss:$2 sm:$0xff] %v2082_v1  ;;  %v58_v15 = vunpack.c.0.s8 %v57_v14  ;;  %v112_v47 = vld [vmem:[%s3307_s2] sm:$0xf]  ;;  %s2027_s13 = smov 112   ;;  %s2028_s2 = smov 111  }
   0x4   :  { %v444_v58 = vld [vmem:[%s3308_s5] sm:$0xff] }
   0x5   :  { %450 = vperm.xlu2 %2007, %v444_v58   ;;  %v126_v60 = vld [vmem:[%s3309_s3] sm:$0xff] }
   0x9   :  { %v36_v2 = vld.sshfl [vmem:[#allocation1] sm:$0xff pattern:$0x75316420]  ;;  %v37_v3 = vld.sshfl [vmem:[#allocation1 + $0x8] sm:$0xff pattern:$0x75316420] }
   0xa   :  { %v38_v4 = vld.sshfl [vmem:[#allocation1 + $0x10] sm:$0xff pattern:$0x75316420]  ;;  %v39_v5 = vld.sshfl [vmem:[#allocation1 + $0x18] sm:$0xff pattern:$0x75316420] }
   0xb   :  { %v45_v6 = vsel %vm44_vm0, %v36_v2, 0.0  ;;  %v46_v7 = vsel %vm44_vm0, %v37_v3, 0.0  ;;  %v48_v8 = vsel %vm44_vm0, %v38_v4, 0.0  ;;  %v50_v10 = vsel %vm44_vm0, %v39_v5, 0.0  ;;  %v445_v3 = vld [vmem:[%s3308_s5 + $0x8] sm:$0xff]  ;;  %v447_v4 = vld [vmem:[%s3308_s5 + $0x18] sm:$0xff] }
   0xc   :  { %v47_v9 = vadd.f32 %v46_v7, %v45_v6  ;;  %v129_v5 = vld [vmem:[%s3309_s3 + $0x18] sm:$0xff] }
   0xd   :  { %455 = vperm.xlu2 %2007, %v445_v3  }
   0xe   :  { %v49_v11 = vadd.f32 %v48_v8, %v47_v9 }
  0x10   :  { %v51_v12 = vadd.f32 %v50_v10, %v49_v11 }
  0x12   :  { %52 = vadd.xlane.f32.xlu0 %v51_v12 }
  0x15   :  { %465 = vperm.xlu2 %2007, %v447_v4  }
  0x5f   :  { %v2148_v34 = vpop.permute.xlu2 %450 }
  0x85   :  { %v53_v16 = vpop.xlane.xlu0 %52 }
  0x86   :  { %v54_v17 = vmul.f32 0.001953125, %v53_v16 }
  0x88   :  { %v59_v18 = vperm.slane %v54_v17, %v58_v15 }
  0x8a   :  { %v61_v19 = vsub.f32 %v2077_v0, %v59_v18  ;;  %v62_v20 = vsub.f32 %v2082_v1, %v59_v18 }
  0x8c   :  { %v63_v21 = vmul.f32 %v61_v19, %v61_v19  ;;  %v64_v22 = vmul.f32 %v62_v20, %v62_v20 }
  0x8e   :  { %67 = vst [vmem:[#allocation1] ss:$2 sm:$0xff] %v63_v21 }
  0x8f   :  { %69 = vst [vmem:[#allocation1 + $0x10] ss:$2 sm:$0xff] %v64_v22 }
  0x95   :  { %v70_v23 = vld.sshfl [vmem:[#allocation1] sm:$0xff pattern:$0x75316420]  ;;  %v71_v24 = vld.sshfl [vmem:[#allocation1 + $0x8] sm:$0xff pattern:$0x75316420] }
  0x96   :  { %v72_v25 = vld.sshfl [vmem:[#allocation1 + $0x10] sm:$0xff pattern:$0x75316420]  ;;  %v78_v26 = vsel %vm44_vm0, %v70_v23, 0.0  ;;  %v79_v27 = vsel %vm44_vm0, %v71_v24, 0.0 }
  0x97   :  { %v73_v28 = vld.sshfl [vmem:[#allocation1 + $0x18] sm:$0xff pattern:$0x75316420]  ;;  %v80_v29 = vadd.f32 %v79_v27, %v78_v26  ;;  %v81_v30 = vsel %vm44_vm0, %v72_v25, 0.0 }
  0x98   :  { %v83_v32 = vsel %vm44_vm0, %v73_v28, 0.0 }
  0x99   :  { %v82_v31 = vadd.f32 %v81_v30, %v80_v29 }
  0x9b   :  { %v84_v33 = vadd.f32 %v83_v32, %v82_v31 }
  0x9d   :  { %85 = vadd.xlane.f32.xlu0 %v84_v33 }
  0xb1   :  { %460 = vperm.xlu0 %2008, %v446_v59  }
 0x110   :  { %v86_v35 = vpop.xlane.xlu0 %85 }
 0x111   :  { %v87_v36 = vmul.f32 0.001953125, %v86_v35  ;;  %v2150_v35 = vpop.permute.xlu2 %455 }
 0x113   :  { %v89_v37 = vadd.f32 1e-05, %v87_v36 }
 0x115   :  { %2009 = vrsqrt.f32 %v89_v37  ;;  %vm96_vm2 = vweird.f32 %v89_v37 }
 0x119   :  { %v2152_v36 = vpop.permute.xlu2 %465 }
 0x11b   :  { %v2010_v38 = vpop.eup %2009 }
 0x11c   :  { %v91_v39 = vmul.f32 %v2010_v38, %v89_v37  ;;  %vm97_vm1 = vweird.f32 %v2010_v38 }
 0x11d   :  { %vm98_vm3 = vmor %vm96_vm2, %vm97_vm1 }
 0x11e   :  { %v92_v40 = vmul.f32 %v2010_v38, %v91_v39 }
 0x120   :  { %v93_v41 = vmul.f32 0.5, %v92_v40 }
 0x122   :  { %v94_v42 = vsub.f32 1.5, %v93_v41 }
 0x124   :  { %v95_v44 = vmul.f32 %v2010_v38, %v94_v42 }
 0x126   :  { %v99_v45 = vsel %vm98_vm3, %v2010_v38, %v95_v44 }
 0x127   :  { %v100_v46 = vmul.f32 %v99_v45, %v88_v43  ;;  %v2166_v45 = vpop.permute.xlu0 %460 }
 0x129   :  { %103 = vperm.xlu1 %2006, %v100_v46  }
 0x131   :  { %115 = vperm.xlu1 %2006, %v112_v47  }
 0x19b   :  { %v104_v48 = vpop.permute.xlu1 %103 }
 0x19c   :  { %v108_v49 = vperm.slane %v104_v48, %v58_v15 }
 0x19e   :  { %v110_v51 = vmul.f32 %v108_v49, %v61_v19  ;;  %v111_v52 = vmul.f32 %v108_v49, %v62_v20 }
 0x1a3   :  { %v116_v50 = vpop.permute.xlu1 %115 }
 0x1a4   :  { %v120_v53 = vperm.slane %v116_v50, %v58_v15 }
 0x1a6   :  { %v122_v54 = vadd.f32 %v120_v53, %v110_v51  ;;  %v123_v55 = vadd.f32 %v120_v53, %v111_v52 }
 0x1a8   :  { %v124_v56 = vmax.f32 %v122_v54, 0.0  ;;  %v125_v57 = vmax.f32 %v123_v55, 0.0 }
 0x1aa   :  { %132 = vst [vmem:[#allocation1] ss:$2 sm:$0xff] %v124_v56 }
 0x1ab   :  { %134 = vst [vmem:[#allocation1 + $0x10] ss:$2 sm:$0xff] %v125_v57 }
 0x1b1   :  { %v135_v61 = vld.sshfl [vmem:[#allocation1] sm:$0xff pattern:$0x75316420]  ;;  %v136_v62 = vld.sshfl [vmem:[#allocation1 + $0x8] sm:$0xff pattern:$0x75316420] }
 0x1b2   :  { %1925 = vmatpush.msk.msra.mxu0 %vm44_vm0, %v135_v61  ;;  %1930 = vmatpush.msk.msra.mxu1 %vm44_vm0, %v136_v62  ;;  %1906 = vst [vmem:[#allocation1] ss:$2 sm:$0xff] %v2077_v0  ;;  %v137_v63 = vld.sshfl [vmem:[#allocation1 + $0x10] sm:$0xff pattern:$0x75316420]  ;;  %v127_v0 = vld [vmem:[%s3309_s3 + $0x8] sm:$0xff] }
 0x1b3   :  { %1935 = vmatpush.msk.msra.mxu2 %vm44_vm0, %v137_v63  ;;  %v138_v2 = vld.sshfl [vmem:[#allocation1 + $0x18] sm:$0xff pattern:$0x75316420]  ;;  %1926 = vmatmul.msk.f32.vlgmr.msra.gmra.mxu0 %vm139_vm4, %v126_v60 }
 0x1b4   :  { %1940 = vmatpush.msk.msra.mxu3 %vm44_vm0, %v138_v2  ;;  %1908 = vst [vmem:[#allocation1 + $0x10] ss:$2 sm:$0xff] %v2082_v1  ;;  %1936 = vmatmul.msk.f32.vlgmr.msra.gmra.mxu2 %vm139_vm4, %v126_v60  ;;  %v128_v1 = vld [vmem:[%s3309_s3 + $0x10] sm:$0xff] }
 0x1b5   :  { %1941 = vmatmul.msk.f32.vlgmr.msra.gmra.mxu3 %vm139_vm4, %v126_v60  ;;  %1931 = vmatmul.msk.f32.vlgmr.msra.gmra.mxu1 %vm139_vm4, %v126_v60 }
 0x1bb   :  { %1927 = vmatmul.msk.f32.gmra.mxu0 %vm139_vm4, %v127_v0 }
 0x1bc   :  { %1937 = vmatmul.msk.f32.gmra.mxu2 %vm139_vm4, %v127_v0 }
 0x1bd   :  { %1942 = vmatmul.msk.f32.gmra.mxu3 %vm139_vm4, %v127_v0  ;;  %1932 = vmatmul.msk.f32.gmra.mxu1 %vm139_vm4, %v127_v0 }
 0x1c3   :  { %1928 = vmatmul.msk.f32.gmra.mxu0 %vm139_vm4, %v128_v1 }
 0x1c4   :  { %1938 = vmatmul.msk.f32.gmra.mxu2 %vm139_vm4, %v128_v1 }
 0x1c5   :  { %1943 = vmatmul.msk.f32.gmra.mxu3 %vm139_vm4, %v128_v1  ;;  %1933 = vmatmul.msk.f32.gmra.mxu1 %vm139_vm4, %v128_v1 }
 0x1cb   :  { %1929 = vmatmul.msk.f32.gmra.mxu0 %vm139_vm4, %v129_v5 }
 0x1cc   :  { %1939 = vmatmul.msk.f32.gmra.mxu2 %vm139_vm4, %v129_v5 }
 0x1cd   :  { %1944 = vmatmul.msk.f32.gmra.mxu3 %vm139_vm4, %v129_v5  ;;  %1934 = vmatmul.msk.f32.gmra.mxu1 %vm139_vm4, %v129_v5 }
 0x230   :  { %v177_v6 = vpop.f32.mrf.mxu0 }
 0x232   :  { %v206_v7 = vpop.f32.mrf.mxu1 }
 0x233   :  { %v276_v8 = vadd.f32 %v206_v7, %v177_v6 }
 0x237   :  { %v235_v9 = vpop.f32.mrf.mxu2 }
 0x238   :  { %v277_v10 = vadd.f32 %v276_v8, %v235_v9  ;;  %v264_v11 = vpop.f32.mrf.mxu3  ;;  %v180_v12 = vpop.f32.mrf.mxu0 }
 0x23a   :  { %v278_v13 = vadd.f32 %v277_v10, %v264_v11  ;;  %v209_v14 = vpop.f32.mrf.mxu1 }
 0x23b   :  { %v281_v15 = vadd.f32 %v209_v14, %v180_v12 }
 0x23c   :  { %279 = vadd.xlane.f32.xlu2 %v278_v13 }
 0x23f   :  { %v238_v16 = vpop.f32.mrf.mxu2 }
 0x240   :  { %v282_v17 = vadd.f32 %v281_v15, %v238_v16  ;;  %v267_v18 = vpop.f32.mrf.mxu3  ;;  %v183_v19 = vpop.f32.mrf.mxu0 }
 0x242   :  { %v283_v20 = vadd.f32 %v282_v17, %v267_v18  ;;  %v212_v21 = vpop.f32.mrf.mxu1 }
 0x243   :  { %v286_v22 = vadd.f32 %v212_v21, %v183_v19 }
 0x244   :  { %284 = vadd.xlane.f32.xlu2 %v283_v20 }
 0x247   :  { %v241_v23 = vpop.f32.mrf.mxu2 }
 0x248   :  { %v287_v24 = vadd.f32 %v286_v22, %v241_v23  ;;  %v270_v25 = vpop.f32.mrf.mxu3  ;;  %v186_v26 = vpop.f32.mrf.mxu0 }
 0x24a   :  { %v288_v27 = vadd.f32 %v287_v24, %v270_v25  ;;  %v215_v28 = vpop.f32.mrf.mxu1 }
 0x24b   :  { %v291_v29 = vadd.f32 %v215_v28, %v186_v26 }
 0x24c   :  { %289 = vadd.xlane.f32.xlu0 %v288_v27 }
 0x24f   :  { %v244_v30 = vpop.f32.mrf.mxu2 }
 0x250   :  { %v292_v31 = vadd.f32 %v291_v29, %v244_v30  ;;  %v273_v32 = vpop.f32.mrf.mxu3 }
 0x252   :  { %v293_v33 = vadd.f32 %v292_v31, %v273_v32 }
 0x254   :  { %294 = vadd.xlane.f32.xlu1 %v293_v33 }
 0x2af   :  { %v280_v37 = vpop.xlane.xlu2 %279 }
 0x2b0   :  { %v296_v38 = vmul.f32 0.001953125, %v280_v37 }
 0x2b2   :  { %v2154_v39 = vsub.f32 %v177_v6, %v296_v38  ;;  %v2156_v40 = vsub.f32 %v206_v7, %v296_v38  ;;  %v2158_v41 = vsub.f32 %v235_v9, %v296_v38  ;;  %v2160_v42 = vsub.f32 %v264_v11, %v296_v38 }
 0x2b4   :  { %v316_v43 = vmul.f32 %v2154_v39, %v2154_v39  ;;  %v317_v44 = vmul.f32 %v2156_v40, %v2156_v40  ;;  %v318_v46 = vmul.f32 %v2158_v41, %v2158_v41  ;;  %v319_v50 = vmul.f32 %v2160_v42, %v2160_v42 }
 0x2b6   :  { %v332_v47 = vadd.f32 %v317_v44, %v316_v43 }
 0x2b7   :  { %v285_v48 = vpop.xlane.xlu2 %284 }
 0x2b8   :  { %v297_v49 = vmul.f32 0.001953125, %v285_v48  ;;  %v333_v51 = vadd.f32 %v332_v47, %v318_v46 }
 0x2ba   :  { %v2172_v52 = vsub.f32 %v180_v12, %v297_v49  ;;  %v2174_v53 = vsub.f32 %v209_v14, %v297_v49  ;;  %v334_v54 = vadd.f32 %v333_v51, %v319_v50  ;;  %v2176_v55 = vsub.f32 %v238_v16, %v297_v49  ;;  %v356_v50 = vld [vmem:[%s3310_s4] sm:$0xff] }
 0x2bb   :  { %v2178_v56 = vsub.f32 %v267_v18, %v297_v49 }
 0x2bc   :  { %335 = vadd.xlane.f32.xlu2 %v334_v54  ;;  %v320_v57 = vmul.f32 %v2172_v52, %v2172_v52  ;;  %v321_v58 = vmul.f32 %v2174_v53, %v2174_v53  ;;  %v322_v59 = vmul.f32 %v2176_v55, %v2176_v55 }
 0x2bd   :  { %v323_v63 = vmul.f32 %v2178_v56, %v2178_v56 }
 0x2be   :  { %v337_v60 = vadd.f32 %v321_v58, %v320_v57 }
 0x2bf   :  { %v290_v61 = vpop.xlane.xlu0 %289 }
 0x2c0   :  { %v298_v62 = vmul.f32 0.001953125, %v290_v61  ;;  %v338_v2 = vadd.f32 %v337_v60, %v322_v59 }
 0x2c2   :  { %v2188_v3 = vsub.f32 %v183_v19, %v298_v62  ;;  %v2190_v0 = vsub.f32 %v212_v21, %v298_v62  ;;  %v339_v4 = vadd.f32 %v338_v2, %v323_v63  ;;  %v2192_v1 = vsub.f32 %v241_v23, %v298_v62 }
 0x2c3   :  { %v2194_v5 = vsub.f32 %v270_v25, %v298_v62 }
 0x2c4   :  { %340 = vadd.xlane.f32.xlu0 %v339_v4  ;;  %v324_v6 = vmul.f32 %v2188_v3, %v2188_v3  ;;  %v325_v7 = vmul.f32 %v2190_v0, %v2190_v0  ;;  %v326_v8 = vmul.f32 %v2192_v1, %v2192_v1 }
 0x2c5   :  { %v327_v12 = vmul.f32 %v2194_v5, %v2194_v5 }
 0x2c6   :  { %v342_v9 = vadd.f32 %v325_v7, %v324_v6  ;;  %v357_v6 = vld [vmem:[%s3310_s4 + $0x8] sm:$0xff] }
 0x2c7   :  { %v295_v10 = vpop.xlane.xlu1 %294 }
 0x2c8   :  { %v299_v11 = vmul.f32 0.001953125, %v295_v10  ;;  %v343_v13 = vadd.f32 %v342_v9, %v326_v8 }
 0x2ca   :  { %v2204_v14 = vsub.f32 %v186_v26, %v299_v11  ;;  %v2206_v15 = vsub.f32 %v215_v28, %v299_v11  ;;  %v344_v16 = vadd.f32 %v343_v13, %v327_v12  ;;  %v2208_v17 = vsub.f32 %v244_v30, %v299_v11 }
 0x2cb   :  { %v2210_v18 = vsub.f32 %v273_v32, %v299_v11 }
 0x2cc   :  { %345 = vadd.xlane.f32.xlu2 %v344_v16  ;;  %v328_v19 = vmul.f32 %v2204_v14, %v2204_v14  ;;  %v329_v20 = vmul.f32 %v2206_v15, %v2206_v15  ;;  %v330_v21 = vmul.f32 %v2208_v17, %v2208_v17 }
 0x2cd   :  { %v331_v23 = vmul.f32 %v2210_v18, %v2210_v18 }
 0x2ce   :  { %v347_v22 = vadd.f32 %v329_v20, %v328_v19  ;;  %v358_v19 = vld [vmem:[%s3310_s4 + $0x10] sm:$0xff] }
 0x2d0   :  { %v348_v24 = vadd.f32 %v347_v22, %v330_v21 }
 0x2d2   :  { %v349_v25 = vadd.f32 %v348_v24, %v331_v23 }
 0x2d4   :  { %350 = vadd.xlane.f32.xlu0 %v349_v25 }
 0x32f   :  { %v336_v26 = vpop.xlane.xlu2 %335 }
 0x330   :  { %v352_v27 = vmul.f32 0.001953125, %v336_v26  ;;  %v359_v26 = vld [vmem:[%s3310_s4 + $0x18] sm:$0xff]  ;;  %s2021_s4 = smov 17  }
 0x332   :  { %v360_v28 = vadd.f32 1e-05, %v352_v27 }
 0x334   :  { %2011 = vrsqrt.f32 %v360_v28  ;;  %vm370_vm6 = vweird.f32 %v360_v28 }
 0x337   :  { %v341_v29 = vpop.xlane.xlu0 %340 }
 0x338   :  { %v353_v30 = vmul.f32 0.001953125, %v341_v29 }
 0x33a   :  { %v2012_v31 = vpop.eup %2011  ;;  %v361_v32 = vadd.f32 1e-05, %v353_v30 }
 0x33b   :  { %v365_v33 = vmul.f32 %v2012_v31, %v360_v28  ;;  %vm371_vm5 = vweird.f32 %v2012_v31 }
 0x33c   :  { %2013 = vrsqrt.f32 %v361_v32  ;;  %vm372_vm7 = vmor %vm370_vm6, %vm371_vm5  ;;  %vm380_vm9 = vweird.f32 %v361_v32 }
 0x33d   :  { %v366_v37 = vmul.f32 %v2012_v31, %v365_v33 }
 0x33f   :  { %v367_v38 = vmul.f32 0.5, %v366_v37  ;;  %v346_v43 = vpop.xlane.xlu2 %345 }
 0x340   :  { %v354_v44 = vmul.f32 0.001953125, %v346_v43 }
 0x341   :  { %v368_v46 = vsub.f32 1.5, %v367_v38 }
 0x342   :  { %v2014_v47 = vpop.eup %2013  ;;  %v362_v48 = vadd.f32 1e-05, %v354_v44 }
 0x343   :  { %v375_v49 = vmul.f32 %v2014_v47, %v361_v32  ;;  %v369_v51 = vmul.f32 %v2012_v31, %v368_v46  ;;  %vm381_vm8 = vweird.f32 %v2014_v47 }
 0x344   :  { %2015 = vrsqrt.f32 %v362_v48  ;;  %vm382_vm10 = vmor %vm380_vm9, %vm381_vm8  ;;  %vm390_vm12 = vweird.f32 %v362_v48  ;;  %vm656_vm8 = vcmask 261120  }
 0x345   :  { %v376_v54 = vmul.f32 %v2014_v47, %v375_v49  ;;  %v373_v57 = vsel %vm372_vm7, %v2012_v31, %v369_v51 }
 0x346   :  { %v404_v58 = vmul.f32 %v373_v57, %v356_v50 }
 0x347   :  { %v377_v59 = vmul.f32 0.5, %v376_v54  ;;  %v351_v60 = vpop.xlane.xlu0 %350 }
 0x348   :  { %v355_v61 = vmul.f32 0.001953125, %v351_v60  ;;  %410 = vperm.xlu2 %2007, %v404_v58  }
 0x349   :  { %v378_v62 = vsub.f32 1.5, %v377_v59 }
 0x34a   :  { %v2016_v63 = vpop.eup %2015  ;;  %v363_v2 = vadd.f32 1e-05, %v355_v61  ;;  %v532_v61 = vlaneseq }
 0x34b   :  { %v385_v4 = vmul.f32 %v2016_v63, %v362_v48  ;;  %v379_v7 = vmul.f32 %v2014_v47, %v378_v62  ;;  %vm391_vm11 = vweird.f32 %v2016_v63 }
 0x34c   :  { %2017 = vrsqrt.f32 %v363_v2  ;;  %vm392_vm13 = vmor %vm390_vm12, %vm391_vm11  ;;  %vm400_vm15 = vweird.f32 %v363_v2 }
 0x34d   :  { %v386_v8 = vmul.f32 %v2016_v63, %v385_v4  ;;  %v383_v9 = vsel %vm382_vm10, %v2014_v47, %v379_v7 }
 0x34e   :  { %v405_v10 = vmul.f32 %v383_v9, %v357_v6 }
 0x34f   :  { %v387_v11 = vmul.f32 0.5, %v386_v8 }
 0x350   :  { %415 = vperm.xlu0 %2008, %v405_v10  }
 0x351   :  { %v388_v12 = vsub.f32 1.5, %v387_v11 }
 0x352   :  { %v2018_v13 = vpop.eup %2017 }
 0x353   :  { %v395_v16 = vmul.f32 %v2018_v13, %v363_v2  ;;  %v389_v20 = vmul.f32 %v2016_v63, %v388_v12  ;;  %vm401_vm14 = vweird.f32 %v2018_v13  ;;  %v2352_v2 = vand.u32 127, %v532_v61 }
 0x354   :  { %vm402_vm0 = vmor %vm400_vm15, %vm401_vm14 }
 0x355   :  { %v396_v21 = vmul.f32 %v2018_v13, %v395_v16  ;;  %v393_v22 = vsel %vm392_vm13, %v2016_v63, %v389_v20  ;;  %vm855_vm1 = vcmp.lt.s32.totalorder %v2352_v2, 15  ;;  %vm534_vm2 = vcmp.lt.s32.totalorder %v2352_v2, 17 }
 0x356   :  { %v406_v23 = vmul.f32 %v393_v22, %v358_v19  ;;  %vm610_vm3 = vcmp.lt.s32.totalorder %v2352_v2, 16  ;;  %vm1439_vm4 = vcmp.lt.s32.totalorder %v2352_v2, 113  ;;  %vm1020_vm5 = vcmp.lt.s32.totalorder %v2352_v2, 1 }
 0x357   :  { %v397_v24 = vmul.f32 0.5, %v396_v21  ;;  %vm1274_vm6 = vcmp.lt.s32.totalorder %v2352_v2, 127  ;;  %vm1604_vm7 = vcmp.lt.s32.totalorder %v2352_v2, 112  ;;  %vm1769_vm9 = vcmp.lt.s32.totalorder %v2352_v2, 111 }
 0x358   :  { %420 = vperm.xlu2 %2007, %v406_v23  }
 0x359   :  { %v398_v25 = vsub.f32 1.5, %v397_v24 }
 0x35b   :  { %v399_v27 = vmul.f32 %v2018_v13, %v398_v25 }
 0x35d   :  { %v403_v28 = vsel %vm402_vm0, %v2018_v13, %v399_v27 }
 0x35e   :  { %v407_v29 = vmul.f32 %v403_v28, %v359_v26 }
 0x360   :  { %425 = vperm.xlu1 %2006, %v407_v29  }
 0x3a2   :  { %v411_v30 = vpop.permute.xlu2 %410 }
 0x3a3   :  { %v428_v31 = vmul.f32 %v411_v30, %v2154_v39  ;;  %v429_v32 = vmul.f32 %v411_v30, %v2156_v40  ;;  %v430_v33 = vmul.f32 %v411_v30, %v2158_v41  ;;  %v431_v48 = vmul.f32 %v411_v30, %v2160_v42 }
 0x3a5   :  { %v468_v37 = vadd.f32 %v2148_v34, %v428_v31  ;;  %v469_v38 = vadd.f32 %v2148_v34, %v429_v32  ;;  %v470_v43 = vadd.f32 %v2148_v34, %v430_v33  ;;  %v471_v39 = vadd.f32 %v2148_v34, %v431_v48 }
 0x3a7   :  { %v2238_v44 = vmax.f32 %v468_v37, 0.0  ;;  %v2240_v46 = vmax.f32 %v469_v38, 0.0  ;;  %v2242_v47 = vmax.f32 %v470_v43, 0.0  ;;  %v2252_v40 = vmax.f32 %v471_v39, 0.0 }
 0x3a9   :  { %3336 = vst [vmem:[#allocation2_spill] sm:$0xff] %v2238_v44  ;;  %516 = vrot.lane.b32.xlu2 %v2242_v47, %s2021_s4  ;;  %508 = vrot.lane.b32.xlu0 %v2240_v46, %s2021_s4 }
 0x3aa   :  { %3337 = vst [vmem:[#allocation3_spill] sm:$0xff] %v2240_v46  ;;  %500 = vrot.lane.b32.xlu1 %v2238_v44, %s2021_s4 }
 0x3ab   :  { %3338 = vst [vmem:[#allocation4_spill] sm:$0xff] %v2242_v47 }
 0x3ac   :  { %3339 = vst [vmem:[#allocation5_spill] sm:$0xff] %v2252_v40 }
 0x3b1   :  { %586 = vrot.lane.b32.xlu2 %v2240_v46, %s2022_s9  ;;  %578 = vrot.lane.b32.xlu0 %v2238_v44, %s2022_s9 }
 0x3b2   :  { %524 = vrot.lane.b32.xlu1 %v2252_v40, %s2021_s4 }
 0x3b9   :  { %823 = vrot.lane.b32.xlu2 %v2238_v44, %s2023_s10  ;;  %602 = vrot.lane.b32.xlu0 %v2252_v40, %s2022_s9 }
 0x3ba   :  { %594 = vrot.lane.b32.xlu1 %v2242_v47, %s2022_s9 }
 0x3c1   :  { %847 = vrot.lane.b32.xlu2 %v2252_v40, %s2023_s10  ;;  %839 = vrot.lane.b32.xlu0 %v2242_v47, %s2023_s10 }
 0x3c2   :  { %831 = vrot.lane.b32.xlu1 %v2240_v46, %s2023_s10  ;;  %v416_v34 = vpop.permute.xlu0 %415 }
 0x3c3   :  { %v432_v41 = vmul.f32 %v416_v34, %v2172_v52  ;;  %v433_v42 = vmul.f32 %v416_v34, %v2174_v53  ;;  %v435_v51 = vmul.f32 %v416_v34, %v2178_v56  ;;  %v434_v53 = vmul.f32 %v416_v34, %v2176_v55  ;;  %v2330_v55 = vpop.permute.xlu2 %420 }
 0x3c4   :  { %v436_v37 = vmul.f32 %v2330_v55, %v2188_v3 }
 0x3c5   :  { %v472_v49 = vadd.f32 %v2150_v35, %v432_v41  ;;  %v473_v50 = vadd.f32 %v2150_v35, %v433_v42  ;;  %v475_v57 = vadd.f32 %v2150_v35, %v435_v51  ;;  %v474_v58 = vadd.f32 %v2150_v35, %v434_v53 }
 0x3c6   :  { %v476_v38 = vadd.f32 %v2166_v45, %v436_v37  ;;  %v438_v42 = vmul.f32 %v2330_v55, %v2192_v1  ;;  %v437_v51 = vmul.f32 %v2330_v55, %v2190_v0 }
 0x3c7   :  { %v2307_v54 = vmax.f32 %v472_v49, 0.0  ;;  %v2309_v52 = vmax.f32 %v473_v50, 0.0  ;;  %v2320_v56 = vmax.f32 %v475_v57, 0.0  ;;  %v2322_v59 = vmax.f32 %v474_v58, 0.0 }
 0x3c8   :  { %v439_v49 = vmul.f32 %v2330_v55, %v2194_v5  ;;  %v2463_v50 = vmax.f32 %v476_v38, 0.0  ;;  %v478_v53 = vadd.f32 %v2166_v45, %v438_v42  ;;  %v477_v58 = vadd.f32 %v2166_v45, %v437_v51 }
 0x3c9   :  { %1004 = vrot.lane.b32.xlu2 %v2242_v47, %s2024_s11  ;;  %996 = vrot.lane.b32.xlu0 %v2240_v46, %s2024_s11  ;;  %3340 = vst [vmem:[#allocation6_spill] sm:$0xff] %v2307_v54 }
 0x3ca   :  { %988 = vrot.lane.b32.xlu1 %v2238_v44, %s2024_s11  ;;  %3341 = vst [vmem:[#allocation7_spill] sm:$0xff] %v2309_v52  ;;  %v479_v1 = vadd.f32 %v2166_v45, %v439_v49 }
 0x3cb   :  { %3342 = vst [vmem:[#allocation8_spill] sm:$0xff] %v2320_v56 }
 0x3cc   :  { %3343 = vst [vmem:[#allocation9_spill] sm:$0xff] %v2322_v59  ;;  %v2486_v61 = vmax.f32 %v479_v1, 0.0 }
 0x3cd   :  { %3348 = vst [vmem:[#allocation14_spill] sm:$0xff] %v2463_v50 }
 0x3ce   :  { %3352 = vst [vmem:[#allocation18_spill] sm:$0xff] %v2486_v61 }
 0x3d1   :  { %1407 = vrot.lane.b32.xlu2 %v2238_v44, %s2025_s1  ;;  %1242 = vrot.lane.b32.xlu0 %v2238_v44, %s2026_s12 }
 0x3d2   :  { %1012 = vrot.lane.b32.xlu1 %v2252_v40, %s2024_s11  ;;  %v2350_v63 = vpop.permute.xlu1 %425 }
 0x3d9   :  { %1431 = vrot.lane.b32.xlu2 %v2252_v40, %s2025_s1  ;;  %1266 = vrot.lane.b32.xlu0 %v2252_v40, %s2026_s12 }
 0x3da   :  { %1258 = vrot.lane.b32.xlu1 %v2242_v47, %s2026_s12 }
 0x3e1   :  { %1415 = vrot.lane.b32.xlu2 %v2240_v46, %s2025_s1  ;;  %1250 = vrot.lane.b32.xlu0 %v2240_v46, %s2026_s12 }
 0x3e2   :  { %1572 = vrot.lane.b32.xlu1 %v2238_v44, %s2027_s13 }
 0x3e9   :  { %1588 = vrot.lane.b32.xlu2 %v2242_v47, %s2027_s13  ;;  %1423 = vrot.lane.b32.xlu0 %v2242_v47, %s2025_s1 }
 0x3ea   :  { %1596 = vrot.lane.b32.xlu1 %v2252_v40, %s2027_s13 }
 0x3f1   :  { %510 = vrot.lane.b32.xlu2 %v2309_v52, %s2021_s4  ;;  %502 = vrot.lane.b32.xlu0 %v2307_v54, %s2021_s4 }
 0x3f2   :  { %1580 = vrot.lane.b32.xlu1 %v2240_v46, %s2027_s13 }
 0x3f9   :  { %580 = vrot.lane.b32.xlu2 %v2307_v54, %s2022_s9  ;;  %526 = vrot.lane.b32.xlu0 %v2320_v56, %s2021_s4 }
 0x3fa   :  { %518 = vrot.lane.b32.xlu1 %v2322_v59, %s2021_s4 }
 0x401   :  { %604 = vrot.lane.b32.xlu2 %v2320_v56, %s2022_s9  ;;  %596 = vrot.lane.b32.xlu0 %v2322_v59, %s2022_s9 }
 0x402   :  { %588 = vrot.lane.b32.xlu1 %v2309_v52, %s2022_s9 }
 0x403   :  { %v517_v35 = vpop.permute.xlu2 %516 }
 0x409   :  { %841 = vrot.lane.b32.xlu2 %v2322_v59, %s2023_s10  ;;  %833 = vrot.lane.b32.xlu0 %v2309_v52, %s2023_s10 }
 0x40a   :  { %825 = vrot.lane.b32.xlu1 %v2307_v54, %s2023_s10 }
 0x40b   :  { %v587_v60 = vpop.permute.xlu2 %586 }
 0x411   :  { %998 = vrot.lane.b32.xlu2 %v2309_v52, %s2024_s11  ;;  %990 = vrot.lane.b32.xlu0 %v2307_v54, %s2024_s11 }
 0x412   :  { %849 = vrot.lane.b32.xlu1 %v2320_v56, %s2023_s10 }
 0x413   :  { %v824_v62 = vpop.permute.xlu2 %823 }
 0x419   :  { %1260 = vrot.lane.b32.xlu2 %v2322_v59, %s2026_s12  ;;  %1014 = vrot.lane.b32.xlu0 %v2320_v56, %s2024_s11 }
 0x41a   :  { %1006 = vrot.lane.b32.xlu1 %v2322_v59, %s2024_s11 }
 0x41b   :  { %v848_v4 = vpop.permute.xlu2 %847  ;;  %v509_v6 = vpop.permute.xlu0 %508 }
 0x41c   :  { %v2364_v7 = vsel %vm855_vm1, %v848_v4, %v824_v62  ;;  %v501_v8 = vpop.permute.xlu1 %500  ;;  %v2368_v9 = vsel %vm534_vm2, %v509_v6, %v517_v35 }
 0x41d   :  { %v2372_v10 = vsel %vm534_vm2, %v501_v8, %v509_v6 }
 0x421   :  { %1409 = vrot.lane.b32.xlu2 %v2307_v54, %s2025_s1  ;;  %1244 = vrot.lane.b32.xlu0 %v2307_v54, %s2026_s12 }
 0x422   :  { %1268 = vrot.lane.b32.xlu1 %v2320_v56, %s2026_s12 }
 0x423   :  { %v1005_v11 = vpop.permute.xlu2 %1004  ;;  %v579_v12 = vpop.permute.xlu0 %578 }
 0x424   :  { %v525_v13 = vpop.permute.xlu1 %524  ;;  %v2383_v16 = vsel %vm610_vm3, %v579_v12, %v587_v60 }
 0x425   :  { %v2387_v19 = vsel %vm534_vm2, %v517_v35, %v525_v13  ;;  %v2391_v20 = vsel %vm534_vm2, %v525_v13, %v501_v8 }
 0x429   :  { %1598 = vrot.lane.b32.xlu2 %v2320_v56, %s2027_s13  ;;  %1433 = vrot.lane.b32.xlu0 %v2320_v56, %s2025_s1 }
 0x42a   :  { %1252 = vrot.lane.b32.xlu1 %v2309_v52, %s2026_s12 }
 0x42b   :  { %v1408_v21 = vpop.permute.xlu2 %1407  ;;  %v603_v22 = vpop.permute.xlu0 %602 }
 0x42c   :  { %v595_v23 = vpop.permute.xlu1 %594  ;;  %v2401_v24 = vsel %vm610_vm3, %v603_v22, %v579_v12 }
 0x42d   :  { %v2405_v25 = vsel %vm610_vm3, %v587_v60, %v595_v23  ;;  %v2409_v26 = vsel %vm610_vm3, %v595_v23, %v603_v22  ;;  %v2484_v60 = vmax.f32 %v478_v53, 0.0 }
 0x42f   :  { %3351 = vst [vmem:[#allocation17_spill] sm:$0xff] %v2484_v60 }
 0x431   :  { %1582 = vrot.lane.b32.xlu2 %v2309_v52, %s2027_s13  ;;  %1417 = vrot.lane.b32.xlu0 %v2309_v52, %s2025_s1 }
 0x432   :  { %1425 = vrot.lane.b32.xlu1 %v2322_v59, %s2025_s1 }
 0x433   :  { %v2418_v27 = vpop.permute.xlu2 %1431  ;;  %v840_v28 = vpop.permute.xlu0 %839 }
 0x434   :  { %v2423_v29 = vsel %vm1439_vm4, %v2418_v27, %v1408_v21  ;;  %v832_v30 = vpop.permute.xlu1 %831  ;;  %v2427_v31 = vsel %vm855_vm1, %v840_v28, %v848_v4 }
 0x435   :  { %3344 = vst [vmem:[#allocation10_spill] sm:$0xff] %v2423_v29  ;;  %v2431_v32 = vsel %vm855_vm1, %v824_v62, %v832_v30  ;;  %v2435_v33 = vsel %vm855_vm1, %v832_v30, %v840_v28  ;;  %v2488_v62 = vmax.f32 %v477_v58, 0.0  ;;  %v441_v29 = vmul.f32 %v2350_v63, %v2206_v15 }
 0x437   :  { %3353 = vst [vmem:[#allocation19_spill] sm:$0xff] %v2488_v62 }
 0x439   :  { %1755 = vrot.lane.b32.xlu2 %v2322_v59, %s2028_s2  ;;  %1590 = vrot.lane.b32.xlu0 %v2322_v59, %s2027_s13 }
 0x43a   :  { %1574 = vrot.lane.b32.xlu1 %v2307_v54, %s2027_s13 }
 0x43b   :  { %v1416_v43 = vpop.permute.xlu2 %1415  ;;  %v997_v48 = vpop.permute.xlu0 %996 }
 0x43c   :  { %v2449_v39 = vsel %vm1439_vm4, %v1408_v21, %v1416_v43  ;;  %v989_v3 = vpop.permute.xlu1 %988  ;;  %v2453_v34 = vsel %vm1020_vm5, %v997_v48, %v1005_v11 }
 0x43d   :  { %3345 = vst [vmem:[#allocation11_spill] sm:$0xff] %v2449_v39  ;;  %v2457_v41 = vsel %vm1020_vm5, %v989_v3, %v997_v48 }
 0x43e   :  { %3346 = vst [vmem:[#allocation12_spill] sm:$0xff] %v2453_v34 }
 0x43f   :  { %3347 = vst [vmem:[#allocation13_spill] sm:$0xff] %v2457_v41 }
 0x441   :  { %504 = vrot.lane.b32.xlu2 %v2463_v50, %s2021_s4  ;;  %1739 = vrot.lane.b32.xlu0 %v2307_v54, %s2028_s2 }
 0x442   :  { %1763 = vrot.lane.b32.xlu1 %v2320_v56, %s2028_s2 }
 0x443   :  { %v1589_v57 = vpop.permute.xlu2 %1588  ;;  %v1243_v5 = vpop.permute.xlu0 %1242 }
 0x444   :  { %v1013_v35 = vpop.permute.xlu1 %1012 }
 0x445   :  { %v2478_v0 = vsel %vm1020_vm5, %v1005_v11, %v1013_v35  ;;  %v2482_v55 = vsel %vm1020_vm5, %v1013_v35, %v989_v3 }
 0x446   :  { %3349 = vst [vmem:[#allocation15_spill] sm:$0xff] %v2478_v0 }
 0x447   :  { %3350 = vst [vmem:[#allocation16_spill] sm:$0xff] %v2482_v55 }
 0x449   :  { %528 = vrot.lane.b32.xlu2 %v2486_v61, %s2021_s4  ;;  %520 = vrot.lane.b32.xlu0 %v2484_v60, %s2021_s4 }
 0x44a   :  { %512 = vrot.lane.b32.xlu1 %v2488_v62, %s2021_s4 }
 0x44b   :  { %v511_v45 = vpop.permute.xlu2 %510  ;;  %v1267_v4 = vpop.permute.xlu0 %1266 }
 0x44c   :  { %v1259_v6 = vpop.permute.xlu1 %1258  ;;  %v2499_v8 = vsel %vm1274_vm6, %v1267_v4, %v1243_v5 }
 0x44d   :  { %3354 = vst [vmem:[#allocation20_spill] sm:$0xff] %v2499_v8  ;;  %v2503_v11 = vsel %vm1274_vm6, %v1259_v6, %v1267_v4  ;;  %v442_v8 = vmul.f32 %v2350_v63, %v2208_v17 }
 0x44e   :  { %3355 = vst [vmem:[#allocation21_spill] sm:$0xff] %v2503_v11  ;;  %v440_v11 = vmul.f32 %v2350_v63, %v2204_v14 }
 0x450   :  { %v480_v17 = vadd.f32 %v2152_v36, %v440_v11 }
 0x451   :  { %598 = vrot.lane.b32.xlu2 %v2484_v60, %s2022_s9  ;;  %590 = vrot.lane.b32.xlu0 %v2488_v62, %s2022_s9 }
 0x452   :  { %582 = vrot.lane.b32.xlu1 %v2463_v50, %s2022_s9 }
 0x453   :  { %v581_v12 = vpop.permute.xlu2 %580  ;;  %v1251_v13 = vpop.permute.xlu0 %1250 }
 0x454   :  { %v1573_v21 = vpop.permute.xlu1 %1572  ;;  %v2513_v22 = vsel %vm1274_vm6, %v1251_v13, %v1259_v6  ;;  %v2517_v23 = vsel %vm1274_vm6, %v1243_v5, %v1251_v13 }
 0x455   :  { %3356 = vst [vmem:[#allocation22_spill] sm:$0xff] %v2513_v22 }
 0x456   :  { %3357 = vst [vmem:[#allocation23_spill] sm:$0xff] %v2517_v23 }
 0x459   :  { %835 = vrot.lane.b32.xlu2 %v2488_v62, %s2023_s10  ;;  %827 = vrot.lane.b32.xlu0 %v2463_v50, %s2023_s10 }
 0x45a   :  { %606 = vrot.lane.b32.xlu1 %v2486_v61, %s2022_s9 }
 0x45b   :  { %v605_v28 = vpop.permute.xlu2 %604  ;;  %v1424_v30 = vpop.permute.xlu0 %1423 }
 0x45c   :  { %v1597_v37 = vpop.permute.xlu1 %1596  ;;  %v2528_v38 = vsel %vm610_vm3, %v605_v28, %v581_v12  ;;  %v2533_v48 = vsel %vm1439_vm4, %v1424_v30, %v2418_v27  ;;  %v2537_v3 = vsel %vm1439_vm4, %v1416_v43, %v1424_v30 }
 0x45d   :  { %3358 = vst [vmem:[#allocation24_spill] sm:$0xff] %v2533_v48  ;;  %v2541_v42 = vsel %vm1604_vm7, %v1589_v57, %v1597_v37  ;;  %v2545_v49 = vsel %vm1604_vm7, %v1597_v37, %v1573_v21 }
 0x45e   :  { %3359 = vst [vmem:[#allocation25_spill] sm:$0xff] %v2537_v3 }
 0x45f   :  { %3360 = vst [vmem:[#allocation26_spill] sm:$0xff] %v2541_v42 }
 0x460   :  { %3361 = vst [vmem:[#allocation27_spill] sm:$0xff] %v2545_v49 }
 0x461   :  { %992 = vrot.lane.b32.xlu2 %v2463_v50, %s2024_s11  ;;  %851 = vrot.lane.b32.xlu0 %v2486_v61, %s2023_s10 }
 0x462   :  { %843 = vrot.lane.b32.xlu1 %v2484_v60, %s2023_s10 }
 0x463   :  { %v842_v27 = vpop.permute.xlu2 %841  ;;  %v503_v43 = vpop.permute.xlu0 %502 }
 0x464   :  { %v1581_v51 = vpop.permute.xlu1 %1580  ;;  %v2555_v53 = vsel %vm534_vm2, %v503_v43, %v511_v45 }
 0x465   :  { %v2559_v1 = vsel %vm1604_vm7, %v1581_v51, %v1589_v57  ;;  %v2563_v5 = vsel %vm1604_vm7, %v1573_v21, %v1581_v51 }
 0x466   :  { %3362 = vst [vmem:[#allocation28_spill] sm:$0xff] %v2559_v1 }
 0x467   :  { %3363 = vst [vmem:[#allocation29_spill] sm:$0xff] %v2563_v5 }
 0x469   :  { %1016 = vrot.lane.b32.xlu2 %v2486_v61, %s2024_s11  ;;  %1008 = vrot.lane.b32.xlu0 %v2484_v60, %s2024_s11 }
 0x46a   :  { %1000 = vrot.lane.b32.xlu1 %v2488_v62, %s2024_s11 }
 0x46b   :  { %v999_v58 = vpop.permute.xlu2 %998  ;;  %v527_v35 = vpop.permute.xlu0 %526 }
 0x46c   :  { %v519_v4 = vpop.permute.xlu1 %518  ;;  %v2573_v57 = vsel %vm534_vm2, %v527_v35, %v503_v43 }
 0x46d   :  { %v2577_v6 = vsel %vm534_vm2, %v511_v45, %v519_v4  ;;  %v2581_v13 = vsel %vm534_vm2, %v519_v4, %v527_v35 }
 0x471   :  { %1262 = vrot.lane.b32.xlu2 %v2484_v60, %s2026_s12  ;;  %1246 = vrot.lane.b32.xlu0 %v2463_v50, %s2026_s12 }
 0x472   :  { %1270 = vrot.lane.b32.xlu1 %v2486_v61, %s2026_s12 }
 0x473   :  { %v1261_v21 = vpop.permute.xlu2 %1260  ;;  %v597_v30 = vpop.permute.xlu0 %596 }
 0x474   :  { %v589_v37 = vpop.permute.xlu1 %588  ;;  %v2591_v45 = vsel %vm610_vm3, %v597_v30, %v605_v28 }
 0x475   :  { %v2595_v43 = vsel %vm610_vm3, %v581_v12, %v589_v37  ;;  %v2599_v51 = vsel %vm610_vm3, %v589_v37, %v597_v30 }
 0x479   :  { %1254 = vrot.lane.b32.xlu2 %v2488_v62, %s2026_s12  ;;  %1411 = vrot.lane.b32.xlu0 %v2463_v50, %s2025_s1 }
 0x47a   :  { %1435 = vrot.lane.b32.xlu1 %v2486_v61, %s2025_s1 }
 0x47b   :  { %v1410_v35 = vpop.permute.xlu2 %1409  ;;  %v834_v28 = vpop.permute.xlu0 %833 }
 0x47c   :  { %v826_v4 = vpop.permute.xlu1 %825  ;;  %v2609_v12 = vsel %vm855_vm1, %v834_v28, %v842_v27 }
 0x47d   :  { %v2613_v30 = vsel %vm855_vm1, %v826_v4, %v834_v28 }
 0x481   :  { %1427 = vrot.lane.b32.xlu2 %v2484_v60, %s2025_s1  ;;  %1600 = vrot.lane.b32.xlu0 %v2486_v61, %s2027_s13 }
 0x482   :  { %1419 = vrot.lane.b32.xlu1 %v2488_v62, %s2025_s1 }
 0x483   :  { %v2621_v37 = vpop.permute.xlu2 %1598  ;;  %v991_v1 = vpop.permute.xlu0 %990 }
 0x484   :  { %v850_v5 = vpop.permute.xlu1 %849  ;;  %v2625_v49 = vsel %vm1020_vm5, %v991_v1, %v999_v58 }
 0x485   :  { %3364 = vst [vmem:[#allocation30_spill] sm:$0xff] %v2625_v49  ;;  %v2629_v28 = vsel %vm855_vm1, %v842_v27, %v850_v5  ;;  %v2633_v42 = vsel %vm855_vm1, %v850_v5, %v826_v4 }
 0x489   :  { %1576 = vrot.lane.b32.xlu2 %v2463_v50, %s2027_s13  ;;  %1584 = vrot.lane.b32.xlu0 %v2488_v62, %s2027_s13 }
 0x48a   :  { %1592 = vrot.lane.b32.xlu1 %v2484_v60, %s2027_s13 }
 0x48b   :  { %v1583_v3 = vpop.permute.xlu2 %1582  ;;  %v1015_v48 = vpop.permute.xlu0 %1014 }
 0x48c   :  { %v1007_v39 = vpop.permute.xlu1 %1006  ;;  %v2643_v27 = vsel %vm1020_vm5, %v1015_v48, %v991_v1 }
 0x48d   :  { %v2647_v5 = vsel %vm1020_vm5, %v999_v58, %v1007_v39  ;;  %v2651_v4 = vsel %vm1020_vm5, %v1007_v39, %v1015_v48  ;;  %v481_v39 = vadd.f32 %v2152_v36, %v441_v29  ;;  %v482_v48 = vadd.f32 %v2152_v36, %v442_v8 }
 0x48e   :  { %3365 = vst [vmem:[#allocation31_spill] sm:$0xff] %v2647_v5  ;;  %v443_v29 = vmul.f32 %v2350_v63, %v2210_v18  ;;  %v2684_v8 = vmax.f32 %v480_v17, 0.0 }
 0x48f   :  { %3366 = vst [vmem:[#allocation32_spill] sm:$0xff] %v2651_v4  ;;  %v2678_v23 = vmax.f32 %v481_v39, 0.0  ;;  %v2680_v56 = vmax.f32 %v482_v48, 0.0 }
 0x490   :  { %3372 = vst [vmem:[#allocation38_spill] sm:$0xff] %v2684_v8  ;;  %v483_v39 = vadd.f32 %v2152_v36, %v443_v29 }
 0x491   :  { %1765 = vrot.lane.b32.xlu2 %v2486_v61, %s2028_s2  ;;  %1757 = vrot.lane.b32.xlu0 %v2484_v60, %s2028_s2  ;;  %3370 = vst [vmem:[#allocation36_spill] sm:$0xff] %v2678_v23 }
 0x492   :  { %1741 = vrot.lane.b32.xlu1 %v2463_v50, %s2028_s2  ;;  %3371 = vst [vmem:[#allocation37_spill] sm:$0xff] %v2680_v56  ;;  %v2705_v17 = vmax.f32 %v483_v39, 0.0 }
 0x493   :  { %v2667_v15 = vpop.permute.xlu2 %1755  ;;  %v1245_v1 = vpop.permute.xlu0 %1244 }
 0x494   :  { %3367 = vst [vmem:[#allocation33_spill] sm:$0xff] %v2667_v15  ;;  %v1269_v58 = vpop.permute.xlu1 %1268 }
 0x495   :  { %v2672_v14 = vsel %vm1274_vm6, %v1261_v21, %v1269_v58  ;;  %v2676_v22 = vsel %vm1274_vm6, %v1269_v58, %v1245_v1  ;;  %3376 = vst [vmem:[#allocation42_spill] sm:$0xff] %v2705_v17 }
 0x496   :  { %3368 = vst [vmem:[#allocation34_spill] sm:$0xff] %v2672_v14 }
 0x497   :  { %3369 = vst [vmem:[#allocation35_spill] sm:$0xff] %v2676_v22 }
 0x499   :  { %522 = vrot.lane.b32.xlu2 %v2680_v56, %s2021_s4  ;;  %514 = vrot.lane.b32.xlu0 %v2678_v23, %s2021_s4 }
 0x49a   :  { %506 = vrot.lane.b32.xlu1 %v2684_v8, %s2021_s4 }
 0x49b   :  { %v505_v11 = vpop.permute.xlu2 %504  ;;  %v1434_v58 = vpop.permute.xlu0 %1433 }
 0x49c   :  { %v1253_v48 = vpop.permute.xlu1 %1252  ;;  %v2695_v15 = vsel %vm1439_vm4, %v1434_v58, %v1410_v35 }
 0x49d   :  { %3373 = vst [vmem:[#allocation39_spill] sm:$0xff] %v2695_v15  ;;  %v2699_v18 = vsel %vm1274_vm6, %v1253_v48, %v1261_v21  ;;  %v2703_v63 = vsel %vm1274_vm6, %v1245_v1, %v1253_v48 }
 0x49e   :  { %3374 = vst [vmem:[#allocation40_spill] sm:$0xff] %v2699_v18 }
 0x49f   :  { %3375 = vst [vmem:[#allocation41_spill] sm:$0xff] %v2703_v63 }
 0x4a1   :  { %592 = vrot.lane.b32.xlu2 %v2678_v23, %s2022_s9  ;;  %584 = vrot.lane.b32.xlu0 %v2684_v8, %s2022_s9 }
 0x4a2   :  { %530 = vrot.lane.b32.xlu1 %v2705_v17, %s2021_s4 }
 0x4a3   :  { %v529_v36 = vpop.permute.xlu2 %528  ;;  %v1418_v29 = vpop.permute.xlu0 %1417 }
 0x4a4   :  { %v1426_v15 = vpop.permute.xlu1 %1425  ;;  %v2715_v21 = vsel %vm534_vm2, %v529_v36, %v505_v11  ;;  %v2719_v1 = vsel %vm1439_vm4, %v1410_v35, %v1418_v29 }
 0x4a5   :  { %3377 = vst [vmem:[#allocation43_spill] sm:$0xff] %v2719_v1  ;;  %v2723_v39 = vsel %vm1439_vm4, %v1426_v15, %v1434_v58  ;;  %v2727_v48 = vsel %vm1439_vm4, %v1418_v29, %v1426_v15 }
 0x4a6   :  { %3378 = vst [vmem:[#allocation44_spill] sm:$0xff] %v2723_v39 }
 0x4a7   :  { %3379 = vst [vmem:[#allocation45_spill] sm:$0xff] %v2727_v48 }
 0x4a9   :  { %829 = vrot.lane.b32.xlu2 %v2684_v8, %s2023_s10  ;;  %608 = vrot.lane.b32.xlu0 %v2705_v17, %s2022_s9 }
 0x4aa   :  { %600 = vrot.lane.b32.xlu1 %v2680_v56, %s2022_s9 }
 0x4ab   :  { %v599_v22 = vpop.permute.xlu2 %598  ;;  %v1591_v35 = vpop.permute.xlu0 %1590 }
 0x4ac   :  { %v1575_v1 = vpop.permute.xlu1 %1574  ;;  %v2738_v58 = vsel %vm1604_vm7, %v1591_v35, %v2621_v37  ;;  %v2742_v15 = vsel %vm1604_vm7, %v1583_v3, %v1591_v35 }
 0x4ad   :  { %3380 = vst [vmem:[#allocation46_spill] sm:$0xff] %v2738_v58  ;;  %v2746_v29 = vsel %vm1604_vm7, %v1575_v1, %v1583_v3  ;;  %v2751_v48 = vsel %vm1604_vm7, %v2621_v37, %v1575_v1 }
 0x4ae   :  { %3381 = vst [vmem:[#allocation47_spill] sm:$0xff] %v2742_v15 }
 0x4af   :  { %3382 = vst [vmem:[#allocation48_spill] sm:$0xff] %v2746_v29 }
 0x4b0   :  { %3383 = vst [vmem:[#allocation49_spill] sm:$0xff] %v2751_v48 }
 0x4b1   :  { %853 = vrot.lane.b32.xlu2 %v2705_v17, %s2023_s10  ;;  %1737 = vrot.lane.b32.xlu0 %v2238_v44, %s2028_s2 }
 0x4b2   :  { %837 = vrot.lane.b32.xlu1 %v2678_v23, %s2023_s10 }
 0x4b3   :  { %v836_v35 = vpop.permute.xlu2 %835  ;;  %v2759_v15 = vpop.permute.xlu0 %1739 }
 0x4b4   :  { %3384 = vst [vmem:[#allocation50_spill] sm:$0xff] %v2759_v15  ;;  %v2761_v58 = vpop.permute.xlu1 %1763 }
 0x4b5   :  { %3385 = vst [vmem:[#allocation51_spill] sm:$0xff] %v2761_v58 }
 0x4b9   :  { %1018 = vrot.lane.b32.xlu2 %v2705_v17, %s2024_s11  ;;  %845 = vrot.lane.b32.xlu0 %v2680_v56, %s2023_s10 }
 0x4ba   :  { %994 = vrot.lane.b32.xlu1 %v2684_v8, %s2024_s11 }
 0x4bb   :  { %v993_v3 = vpop.permute.xlu2 %992  ;;  %v521_v37 = vpop.permute.xlu0 %520 }
 0x4bc   :  { %v513_v1 = vpop.permute.xlu1 %512  ;;  %v2771_v48 = vsel %vm534_vm2, %v521_v37, %v529_v36 }
 0x4bd   :  { %v2775_v15 = vsel %vm534_vm2, %v505_v11, %v513_v1  ;;  %v2779_v58 = vsel %vm534_vm2, %v513_v1, %v521_v37 }
 0x4c1   :  { %1264 = vrot.lane.b32.xlu2 %v2680_v56, %s2026_s12  ;;  %1010 = vrot.lane.b32.xlu0 %v2680_v56, %s2024_s11 }
 0x4c2   :  { %1002 = vrot.lane.b32.xlu1 %v2678_v23, %s2024_s11 }
 0x4c3   :  { %v1017_v29 = vpop.permute.xlu2 %1016  ;;  %v591_v36 = vpop.permute.xlu0 %590 }
 0x4c4   :  { %v583_v39 = vpop.permute.xlu1 %582  ;;  %v2789_v11 = vsel %vm1020_vm5, %v1017_v29, %v993_v3  ;;  %v2793_v37 = vsel %vm610_vm3, %v591_v36, %v599_v22 }
 0x4c5   :  { %v2797_v1 = vsel %vm610_vm3, %v583_v39, %v591_v36 }
 0x4c9   :  { %1256 = vrot.lane.b32.xlu2 %v2678_v23, %s2026_s12  ;;  %1248 = vrot.lane.b32.xlu0 %v2684_v8, %s2026_s12 }
 0x4ca   :  { %1272 = vrot.lane.b32.xlu1 %v2705_v17, %s2026_s12 }
 0x4cb   :  { %v1263_v18 = vpop.permute.xlu2 %1262  ;;  %v828_v14 = vpop.permute.xlu0 %827 }
 0x4cc   :  { %v607_v63 = vpop.permute.xlu1 %606  ;;  %v2807_v59 = vsel %vm855_vm1, %v828_v14, %v836_v35 }
 0x4cd   :  { %v2811_v36 = vsel %vm610_vm3, %v599_v22, %v607_v63  ;;  %v2815_v44 = vsel %vm610_vm3, %v607_v63, %v583_v39 }
 0x4d1   :  { %1437 = vrot.lane.b32.xlu2 %v2705_v17, %s2025_s1  ;;  %1429 = vrot.lane.b32.xlu0 %v2680_v56, %s2025_s1 }
 0x4d2   :  { %1413 = vrot.lane.b32.xlu1 %v2684_v8, %s2025_s1 }
 0x4d3   :  { %v1255_v61 = vpop.permute.xlu2 %1254  ;;  %v852_v60 = vpop.permute.xlu0 %851 }
 0x4d4   :  { %v844_v54 = vpop.permute.xlu1 %843  ;;  %v2825_v22 = vsel %vm1274_vm6, %v1255_v61, %v1263_v18  ;;  %v2829_v63 = vsel %vm855_vm1, %v852_v60, %v828_v14 }
 0x4d5   :  { %3386 = vst [vmem:[#allocation52_spill] sm:$0xff] %v2825_v22  ;;  %v2833_v39 = vsel %vm855_vm1, %v836_v35, %v844_v54  ;;  %v2837_v50 = vsel %vm855_vm1, %v844_v54, %v852_v60 }
 0x4d9   :  { %1594 = vrot.lane.b32.xlu2 %v2680_v56, %s2027_s13  ;;  %1578 = vrot.lane.b32.xlu0 %v2684_v8, %s2027_s13 }
 0x4da   :  { %1421 = vrot.lane.b32.xlu1 %v2678_v23, %s2025_s1 }
 0x4db   :  { %v1428_v22 = vpop.permute.xlu2 %1427  ;;  %v1009_v14 = vpop.permute.xlu0 %1008 }
 0x4dc   :  { %v1001_v0 = vpop.permute.xlu1 %1000  ;;  %v2847_v35 = vsel %vm1020_vm5, %v1009_v14, %v1017_v29 }
 0x4dd   :  { %3387 = vst [vmem:[#allocation53_spill] sm:$0xff] %v2847_v35  ;;  %v2851_v54 = vsel %vm1020_vm5, %v993_v3, %v1001_v0  ;;  %v2855_v60 = vsel %vm1020_vm5, %v1001_v0, %v1009_v14  ;;  %v1946_v35 = vld [vmem:[%s3312_s6 + $0x8] sm:$0xff] }
 0x4e1   :  { %1743 = vrot.lane.b32.xlu2 %v2684_v8, %s2028_s2  ;;  %1586 = vrot.lane.b32.xlu0 %v2678_v23, %s2027_s13 }
 0x4e2   :  { %1602 = vrot.lane.b32.xlu1 %v2705_v17, %s2027_s13 }
 0x4e3   :  { %v1247_v34 = vpop.permute.xlu0 %1246  ;;  %v1577_v41 = vpop.permute.xlu2 %1576 }
 0x4e4   :  { %v1271_v29 = vpop.permute.xlu1 %1270  ;;  %v2865_v3 = vsel %vm1274_vm6, %v1247_v34, %v1255_v61 }
 0x4e5   :  { %3388 = vst [vmem:[#allocation54_spill] sm:$0xff] %v2865_v3  ;;  %v2869_v0 = vsel %vm1274_vm6, %v1263_v18, %v1271_v29  ;;  %v2873_v14 = vsel %vm1274_vm6, %v1271_v29, %v1247_v34 }
 0x4e6   :  { %3389 = vst [vmem:[#allocation55_spill] sm:$0xff] %v2869_v0 }
 0x4e7   :  { %3390 = vst [vmem:[#allocation56_spill] sm:$0xff] %v2873_v14 }
 0x4e9   :  { %1751 = vrot.lane.b32.xlu2 %v2678_v23, %s2028_s2  ;;  %1767 = vrot.lane.b32.xlu0 %v2705_v17, %s2028_s2 }
 0x4ea   :  { %1759 = vrot.lane.b32.xlu1 %v2680_v56, %s2028_s2 }
 0x4eb   :  { %v1412_v8 = vpop.permute.xlu0 %1411  ;;  %v2889_v34 = vpop.permute.xlu2 %1765 }
 0x4ec   :  { %v1436_v61 = vpop.permute.xlu1 %1435  ;;  %3393 = vst [vmem:[#allocation59_spill] sm:$0xff] %v2889_v34 }
 0x4ed   :  { %v2883_v3 = vsel %vm1439_vm4, %v1428_v22, %v1436_v61  ;;  %v2887_v18 = vsel %vm1439_vm4, %v1436_v61, %v1412_v8 }
 0x4ee   :  { %3391 = vst [vmem:[#allocation57_spill] sm:$0xff] %v2883_v3 }
 0x4ef   :  { %3392 = vst [vmem:[#allocation58_spill] sm:$0xff] %v2887_v18 }
 0x4f1   :  { %1749 = vrot.lane.b32.xlu2 %v2488_v62, %s2028_s2  ;;  %1761 = vrot.lane.b32.xlu0 %v2252_v40, %s2028_s2 }
 0x4f2   :  { %1753 = vrot.lane.b32.xlu1 %v2242_v47, %s2028_s2 }
 0x4f3   :  { %v1601_v29 = vpop.permute.xlu0 %1600  ;;  %v2909_v18 = vpop.permute.xlu2 %522 }
 0x4f4   :  { %v1420_v14 = vpop.permute.xlu1 %1419  ;;  %v2899_v3 = vsel %vm1604_vm7, %v1601_v29, %v1577_v41 }
 0x4f5   :  { %3394 = vst [vmem:[#allocation60_spill] sm:$0xff] %v2899_v3  ;;  %v2903_v61 = vsel %vm1439_vm4, %v1420_v14, %v1428_v22  ;;  %v2907_v34 = vsel %vm1439_vm4, %v1412_v8, %v1420_v14 }
 0x4f6   :  { %3395 = vst [vmem:[#allocation61_spill] sm:$0xff] %v2903_v61 }
 0x4f7   :  { %3396 = vst [vmem:[#allocation62_spill] sm:$0xff] %v2907_v34 }
 0x4f9   :  { %1745 = vrot.lane.b32.xlu0 %v2240_v46, %s2028_s2 }
 0x4fa   :  { %1747 = vrot.lane.b32.xlu1 %v2309_v52, %s2028_s2 }
 0x4fb   :  { %v1585_v0 = vpop.permute.xlu0 %1584  ;;  %v593_v14 = vpop.permute.xlu2 %592 }
 0x4fc   :  { %v1593_v40 = vpop.permute.xlu1 %1592  ;;  %v2917_v3 = vsel %vm1604_vm7, %v1577_v41, %v1585_v0  ;;  %v1945_v41 = vld [vmem:[%s3311_s7 + $0x4] sm:$0xf] }
 0x4fd   :  { %3397 = vst [vmem:[#allocation63_spill] sm:$0xff] %v2917_v3  ;;  %v2921_v22 = vsel %vm1604_vm7, %v1593_v40, %v1601_v29  ;;  %v2925_v8 = vsel %vm1604_vm7, %v1585_v0, %v1593_v40  ;;  %v631_v3 = vperm.slane %v1945_v41, 1  ;;  %v630_v4 = vperm.slane %v1945_v41, 0 }
 0x4fe   :  { %3398 = vst [vmem:[#allocation64_spill] sm:$0xff] %v2921_v22  ;;  %v632_v5 = vperm.slane %v1945_v41, 2 }
 0x4ff   :  { %3399 = vst [vmem:[#allocation65_spill] sm:$0xff] %v2925_v8  ;;  %v643_v17 = vmul.f32 %v631_v3, %v2595_v43 }
 0x503   :  { %v2927_v61 = vpop.permute.xlu0 %1757  ;;  %v2933_v46 = vpop.permute.xlu2 %829 }
 0x504   :  { %3400 = vst [vmem:[#allocation66_spill] sm:$0xff] %v2927_v61  ;;  %v2929_v34 = vpop.permute.xlu1 %1741  ;;  %v647_v61 = vmul.f32 %v631_v3, %v2797_v1  ;;  %v633_v1 = vperm.slane %v1945_v41, 3  ;;  %v646_v41 = vmul.f32 %v630_v4, %v2815_v44  ;;  %v644_v44 = vmul.f32 %v632_v5, %v2599_v51 }
 0x505   :  { %3401 = vst [vmem:[#allocation67_spill] sm:$0xff] %v2929_v34  ;;  %v551_v34 = vld [vmem:[%s3311_s7] sm:$0xf] }
 0x506   :  { %v554_v56 = vperm.slane %v551_v34, 1 }
 0x50b   :  { %v2931_v47 = vpop.permute.xlu0 %514  ;;  %v2940_v8 = vpop.permute.xlu2 %853 }
 0x50c   :  { %v507_v52 = vpop.permute.xlu1 %506 }
 0x50d   :  { %v546_v62 = vsel %vm534_vm2, %v507_v52, %v2931_v47 }
 0x50e   :  { %v574_v49 = vmul.f32 %v554_v56, %v546_v62 }
 0x513   :  { %v585_v29 = vpop.permute.xlu0 %584 }
 0x514   :  { %v531_v22 = vpop.permute.xlu1 %530  ;;  %v622_v40 = vsel %vm610_vm3, %v585_v29, %v593_v14 }
 0x515   :  { %v651_v0 = vmul.f32 %v631_v3, %v622_v40  ;;  %v639_v40 = vmul.f32 %v631_v3, %v2383_v16  ;;  %v538_v51 = vsel %vm534_vm2, %v2909_v18, %v531_v22 }
 0x517   :  { %692 = vmatpush.msrb.mxu1 %v651_v0 }
 0x519   :  { %693 = vmatpush.msrb.mxu1 %v647_v61  ;;  %v570_v61 = vmul.f32 %v554_v56, %v2775_v15  ;;  %v562_v15 = vmul.f32 %v554_v56, %v2372_v10  ;;  %v640_v10 = vmul.f32 %v632_v5, %v2405_v25 }
 0x51b   :  { %694 = vmatpush.msrb.mxu1 %v643_v17  ;;  %v609_v23 = vpop.permute.xlu0 %608 }
 0x51c   :  { %v601_v55 = vpop.permute.xlu1 %600  ;;  %v626_v0 = vsel %vm610_vm3, %v609_v23, %v585_v29  ;;  %v2963_v29 = vpop.permute.xlu2 %1018 }
 0x51d   :  { %v618_v43 = vsel %vm610_vm3, %v593_v14, %v601_v55  ;;  %v614_v17 = vsel %vm610_vm3, %v601_v55, %v609_v23  ;;  %695 = vmatpush.msrb.mxu1 %v639_v40  ;;  %v650_v16 = vmul.f32 %v630_v4, %v626_v0  ;;  %v648_v14 = vmul.f32 %v632_v5, %v2793_v37  ;;  %v1955_v37 = vld [vmem:[%s3311_s7 + $0x8] sm:$0xf] }
 0x51e   :  { %v652_v62 = vmul.f32 %v632_v5, %v618_v43  ;;  %v653_v3 = vmul.f32 %v633_v1, %v614_v17  ;;  %1948 = vmatmul.msk.f32.vlgmr.msrb.gmra.mxu1 %vm656_vm8, %v1946_v35  ;;  %v649_v55 = vmul.f32 %v633_v1, %v2811_v36  ;;  %v566_v23 = vmul.f32 %v554_v56, %v2555_v53 }
 0x51f   :  { %775 = vmatpush.msra.mxu1 %v574_v49  ;;  %672 = vmatpush.msrb.mxu0 %v650_v16  ;;  %v642_v49 = vmul.f32 %v630_v4, %v2528_v38  ;;  %v645_v40 = vmul.f32 %v633_v1, %v2591_v45  ;;  %v553_v0 = vperm.slane %v551_v34, 0  ;;  %v550_v53 = vsel %vm534_vm2, %v531_v22, %v507_v52 }
 0x520   :  { %712 = vmatpush.msrb.mxu2 %v652_v62  ;;  %732 = vmatpush.msrb.mxu3 %v653_v3  ;;  %v638_v56 = vmul.f32 %v630_v4, %v2401_v24  ;;  %v876_v38 = vperm.slane %v1955_v37, 1  ;;  %v542_v45 = vsel %vm534_vm2, %v2931_v47, %v2909_v18  ;;  %v641_v52 = vmul.f32 %v633_v1, %v2409_v26 }
 0x521   :  { %776 = vmatpush.msra.mxu1 %v570_v61  ;;  %673 = vmatpush.msrb.mxu0 %v646_v41  ;;  %v555_v17 = vperm.slane %v551_v34, 2  ;;  %v556_v16 = vperm.slane %v551_v34, 3  ;;  %v573_v25 = vmul.f32 %v553_v0, %v550_v53  ;;  %v569_v26 = vmul.f32 %v553_v0, %v2715_v21 }
 0x522   :  { %713 = vmatpush.msrb.mxu2 %v648_v14  ;;  %733 = vmatpush.msrb.mxu3 %v649_v55  ;;  %v565_v22 = vmul.f32 %v553_v0, %v2573_v57  ;;  %v892_v1 = vmul.f32 %v876_v38, %v2807_v59  ;;  %v561_v57 = vmul.f32 %v553_v0, %v2391_v20  ;;  %v877_v14 = vperm.slane %v1955_v37, 2 }
 0x523   :  { %777 = vmatpush.msra.mxu1 %v566_v23  ;;  %674 = vmatpush.msrb.mxu0 %v642_v49  ;;  %v2977_v36 = vpop.permute.xlu0 %1737  ;;  %v575_v47 = vmul.f32 %v555_v17, %v542_v45  ;;  %v576_v4 = vmul.f32 %v556_v16, %v538_v51  ;;  %v571_v18 = vmul.f32 %v555_v17, %v2779_v58  ;;  %v577_v23 = vld [vmem:[%s3312_s6] sm:$0xff] }
 0x524   :  { %v838_v43 = vpop.permute.xlu1 %837  ;;  %714 = vmatpush.msrb.mxu2 %v644_v44  ;;  %734 = vmatpush.msrb.mxu3 %v645_v40  ;;  %v572_v34 = vmul.f32 %v556_v16, %v2771_v48  ;;  %v3000_v62 = vpop.permute.xlu2 %1264  ;;  %v567_v3 = vmul.f32 %v555_v17, %v2577_v6  ;;  %v568_v21 = vmul.f32 %v556_v16, %v2581_v13 }
 0x525   :  { %v867_v24 = vsel %vm855_vm1, %v2933_v46, %v838_v43  ;;  %778 = vmatpush.msra.mxu1 %v562_v15  ;;  %675 = vmatpush.msrb.mxu0 %v638_v56  ;;  %v871_v58 = vsel %vm855_vm1, %v2940_v8, %v2933_v46  ;;  %v888_v59 = vmul.f32 %v876_v38, %v2613_v30  ;;  %v878_v30 = vperm.slane %v1955_v37, 3 }
 0x526   :  { %v896_v5 = vmul.f32 %v876_v38, %v867_v24  ;;  %715 = vmatpush.msrb.mxu2 %v640_v10  ;;  %735 = vmatpush.msrb.mxu3 %v641_v52  ;;  %v563_v13 = vmul.f32 %v555_v17, %v2368_v9  ;;  %v564_v41 = vmul.f32 %v556_v16, %v2387_v19  ;;  %v1956_v52 = vld [vmem:[%s3312_s6 + $0x10] sm:$0xff] }
 0x527   :  { %1947 = vmatmul.msk.f32.vlgmr.msrb.gmra.mxu0 %vm656_vm8, %v1946_v35  ;;  %1949 = vmatmul.msk.f32.vlgmr.msrb.gmra.mxu2 %vm656_vm8, %v1946_v35  ;;  %v884_v20 = vmul.f32 %v876_v38, %v2431_v32  ;;  %v1961_v32 = vld [vmem:[%s3311_s7 + $0xc] sm:$0xf]  ;;  %v893_v15 = vmul.f32 %v877_v14, %v2833_v39  ;;  %v890_v38 = vmul.f32 %v878_v30, %v2629_v28 }
 0x528   :  { %1950 = vmatmul.msk.f32.vlgmr.msrb.gmra.mxu3 %vm656_vm8, %v1946_v35  ;;  %755 = vmatpush.msra.mxu0 %v573_v25  ;;  %v875_v35 = vperm.slane %v1955_v37, 0  ;;  %v1040_v40 = vperm.slane %v1961_v32, 0  ;;  %v894_v37 = vmul.f32 %v878_v30, %v2837_v50  ;;  %v1041_v10 = vperm.slane %v1961_v32, 1 }
 0x529   :  { %795 = vmatpush.msra.mxu2 %v575_v47  ;;  %815 = vmatpush.msra.mxu3 %v576_v4  ;;  %v886_v28 = vmul.f32 %v878_v30, %v2427_v31  ;;  %v3402_v4 = vld [vmem:[#allocation53_spill] sm:$0xff] }
 0x52a   :  { %936 = vmatpush.msrb.mxu1 %v896_v5  ;;  %756 = vmatpush.msra.mxu0 %v569_v26  ;;  %v895_v55 = vmul.f32 %v875_v35, %v871_v58  ;;  %v891_v49 = vmul.f32 %v875_v35, %v2829_v63  ;;  %v883_v56 = vmul.f32 %v875_v35, %v2364_v7  ;;  %v3407_v58 = vld [vmem:[#allocation13_spill] sm:$0xff] }
 0x52b   :  { %796 = vmatpush.msra.mxu2 %v571_v18  ;;  %816 = vmatpush.msra.mxu3 %v572_v34  ;;  %v846_v48 = vpop.permute.xlu0 %845  ;;  %v885_v7 = vmul.f32 %v877_v14, %v2435_v33  ;;  %v1056_v33 = vmul.f32 %v1040_v40, %v2789_v11  ;;  %v1052_v31 = vmul.f32 %v1040_v40, %v2643_v27  ;;  %v3403_v11 = vld [vmem:[#allocation16_spill] sm:$0xff]  ;;  %v3404_v34 = vld [vmem:[#allocation30_spill] sm:$0xff]  ;;  %v3405_v27 = vld [vmem:[#allocation31_spill] sm:$0xff] }
 0x52c   :  { %937 = vmatpush.msrb.mxu1 %v892_v1  ;;  %757 = vmatpush.msra.mxu0 %v565_v22  ;;  %v995_v61 = vpop.permute.xlu1 %994  ;;  %v863_v6 = vsel %vm855_vm1, %v838_v43, %v846_v48  ;;  %v859_v46 = vsel %vm855_vm1, %v846_v48, %v2940_v8  ;;  %v887_v8 = vmul.f32 %v875_v35, %v2633_v42  ;;  %v3035_v0 = vpop.permute.xlu2 %1256  ;;  %v1042_v43 = vperm.slane %v1961_v32, 2  ;;  %v3408_v48 = vld [vmem:[#allocation12_spill] sm:$0xff] }
 0x52d   :  { %797 = vmatpush.msra.mxu2 %v567_v3  ;;  %817 = vmatpush.msra.mxu3 %v568_v21  ;;  %v897_v9 = vmul.f32 %v877_v14, %v863_v6  ;;  %v898_v19 = vmul.f32 %v878_v30, %v859_v46  ;;  %v1036_v63 = vsel %vm1020_vm5, %v2963_v29, %v995_v61  ;;  %v3410_v6 = vld [vmem:[#allocation38_spill] sm:$0xff]  ;;  %v3412_v46 = vld [vmem:[#allocation36_spill] sm:$0xff] }
 0x52e   :  { %938 = vmatpush.msrb.mxu1 %v888_v59  ;;  %758 = vmatpush.msra.mxu0 %v561_v57  ;;  %v889_v42 = vmul.f32 %v877_v14, %v2609_v12  ;;  %v1060_v45 = vmul.f32 %v1040_v40, %v1036_v63  ;;  %v1043_v12 = vperm.slane %v1961_v32, 3  ;;  %v1057_v25 = vmul.f32 %v1041_v10, %v2851_v54  ;;  %v3406_v54 = vld [vmem:[#allocation32_spill] sm:$0xff]  ;;  %v3409_v57 = vld [vmem:[#allocation15_spill] sm:$0xff]  ;;  %v3418_v63 = vld [vmem:[#allocation18_spill] sm:$0xff] }
 0x52f   :  { %798 = vmatpush.msra.mxu2 %v563_v13  ;;  %818 = vmatpush.msra.mxu3 %v564_v41  ;;  %v1058_v47 = vmul.f32 %v1042_v43, %v2855_v60  ;;  %v1048_v18 = vmul.f32 %v1040_v40, %v3403_v11  ;;  %v1053_v22 = vmul.f32 %v1041_v10, %v3404_v34  ;;  %v3411_v41 = vld [vmem:[#allocation14_spill] sm:$0xff]  ;;  %v3416_v32 = vld [vmem:[#allocation19_spill] sm:$0xff]  ;;  %v3431_v34 = vld [vmem:[#allocation56_spill] sm:$0xff] }
 0x530   :  { %916 = vmatpush.msrb.mxu0 %v895_v55  ;;  %939 = vmatpush.msrb.mxu1 %v884_v20  ;;  %v1059_v26 = vmul.f32 %v1043_v12, %v3402_v4  ;;  %v1054_v3 = vmul.f32 %v1042_v43, %v3405_v27  ;;  %v1055_v21 = vmul.f32 %v1043_v12, %v3406_v54  ;;  %v1972_v20 = vld [vmem:[%s3311_s7 + $0x14] sm:$0xf]  ;;  %v3413_v55 = vld [vmem:[#allocation37_spill] sm:$0xff]  ;;  %v3432_v27 = vld [vmem:[#allocation34_spill] sm:$0xff] }
 0x531   :  { %1951 = vmatmul.msk.f32.vlgmr.msra.gmra.mxu0 %vm656_vm8, %v577_v23  ;;  %1952 = vmatmul.msk.f32.vlgmr.msra.gmra.mxu1 %vm656_vm8, %v577_v23  ;;  %v1049_v60 = vmul.f32 %v1041_v10, %v3407_v58  ;;  %v1050_v35 = vmul.f32 %v1042_v43, %v3408_v48  ;;  %v1051_v59 = vmul.f32 %v1043_v12, %v3409_v57  ;;  %v3429_v4 = vld [vmem:[#allocation23_spill] sm:$0xff]  ;;  %v3433_v54 = vld [vmem:[#allocation40_spill] sm:$0xff] }
 0x532   :  { %1953 = vmatmul.msk.f32.vlgmr.msra.gmra.mxu2 %vm656_vm8, %v577_v23  ;;  %1954 = vmatmul.msk.f32.vlgmr.msra.gmra.mxu3 %vm656_vm8, %v577_v23  ;;  %v3414_v23 = vld [vmem:[#allocation42_spill] sm:$0xff]  ;;  %v3430_v11 = vld [vmem:[#allocation55_spill] sm:$0xff] }
 0x533   :  { %917 = vmatpush.msrb.mxu0 %v891_v49  ;;  %956 = vmatpush.msrb.mxu2 %v897_v9  ;;  %v1011_v44 = vpop.permute.xlu0 %1010  ;;  %v1294_v9 = vperm.slane %v1972_v20, 0  ;;  %v3415_v49 = vld [vmem:[#allocation6_spill] sm:$0xff]  ;;  %v3434_v48 = vld [vmem:[#allocation35_spill] sm:$0xff] }
 0x534   :  { %976 = vmatpush.msrb.mxu3 %v898_v19  ;;  %v1003_v53 = vpop.permute.xlu1 %1002  ;;  %v1024_v50 = vsel %vm1020_vm5, %v1011_v44, %v2963_v29  ;;  %v3063_v1 = vpop.permute.xlu2 %1437 }
 0x535   :  { %918 = vmatpush.msrb.mxu0 %v887_v8  ;;  %957 = vmatpush.msrb.mxu2 %v893_v15  ;;  %v1032_v39 = vsel %vm1020_vm5, %v995_v61, %v1003_v53  ;;  %v1028_v51 = vsel %vm1020_vm5, %v1003_v53, %v1011_v44  ;;  %v1063_v29 = vmul.f32 %v1043_v12, %v1024_v50  ;;  %v1962_v61 = vld [vmem:[%s3312_s6 + $0x18] sm:$0xff]  ;;  %v3417_v15 = vld [vmem:[#allocation17_spill] sm:$0xff]  ;;  %v1295_v44 = vperm.slane %v1972_v20, 1  ;;  %v3423_v50 = vld [vmem:[#allocation54_spill] sm:$0xff] }
 0x536   :  { %977 = vmatpush.msrb.mxu3 %v894_v37  ;;  %v1061_v17 = vmul.f32 %v1041_v10, %v1032_v39  ;;  %v1062_v16 = vmul.f32 %v1042_v43, %v1028_v51  ;;  %v1282_v8 = vsel %vm1274_vm6, %v3035_v0, %v3000_v62  ;;  %v3420_v10 = vld [vmem:[#allocation7_spill] sm:$0xff]  ;;  %v1297_v39 = vperm.slane %v1972_v20, 3 }
 0x537   :  { %919 = vmatpush.msrb.mxu0 %v883_v56  ;;  %958 = vmatpush.msrb.mxu2 %v889_v42  ;;  %v3419_v56 = vld [vmem:[#allocation2_spill] sm:$0xff]  ;;  %v1296_v42 = vperm.slane %v1972_v20, 2  ;;  %v1310_v51 = vmul.f32 %v1294_v9, %v3423_v50 }
 0x538   :  { %978 = vmatpush.msrb.mxu3 %v890_v38  ;;  %1101 = vmatpush.msra.mxu1 %v1061_v17  ;;  %v3422_v38 = vld [vmem:[#allocation8_spill] sm:$0xff]  ;;  %v3426_v17 = vld [vmem:[#allocation5_spill] sm:$0xff] }
 0x539   :  { %1081 = vmatpush.msra.mxu0 %v1060_v45  ;;  %959 = vmatpush.msrb.mxu2 %v885_v7  ;;  %v1315_v7 = vmul.f32 %v1295_v44, %v1282_v8 }
 0x53a   :  { %1957 = vmatmul.msk.f32.vlgmr.msrb.gmra.mxu0 %vm656_vm8, %v1956_v52  ;;  %979 = vmatpush.msrb.mxu3 %v886_v28  ;;  %v3425_v28 = vld [vmem:[#allocation4_spill] sm:$0xff] }
 0x53b   :  { %1958 = vmatmul.msk.f32.vlgmr.msrb.gmra.mxu1 %vm656_vm8, %v1956_v52  ;;  %1959 = vmatmul.msk.f32.vlgmr.msrb.gmra.mxu2 %vm656_vm8, %v1956_v52  ;;  %v1249_v24 = vpop.permute.xlu0 %1248 }
 0x53c   :  { %1960 = vmatmul.msk.f32.vlgmr.msrb.gmra.mxu3 %vm656_vm8, %v1956_v52  ;;  %1082 = vmatpush.msra.mxu0 %v1056_v33  ;;  %v1273_v5 = vpop.permute.xlu1 %1272  ;;  %v1286_v30 = vsel %vm1274_vm6, %v1249_v24, %v3035_v0  ;;  %v3090_v19 = vpop.permute.xlu2 %1594  ;;  %v3421_v0 = vld [vmem:[#allocation9_spill] sm:$0xff] }
 0x53d   :  { %1121 = vmatpush.msra.mxu2 %v1062_v16  ;;  %1141 = vmatpush.msra.mxu3 %v1063_v29  ;;  %v1278_v40 = vsel %vm1274_vm6, %v3000_v62, %v1273_v5  ;;  %v1290_v37 = vsel %vm1274_vm6, %v1273_v5, %v1249_v24  ;;  %v1314_v53 = vmul.f32 %v1294_v9, %v1286_v30  ;;  %v3424_v62 = vld [vmem:[#allocation3_spill] sm:$0xff]  ;;  %v1967_v16 = vld [vmem:[%s3312_s6 + $0x20] sm:$0xff]  ;;  %v1978_v29 = vld [vmem:[%s3311_s7 + $0x18] sm:$0xf] }
 0x53e   :  { %1083 = vmatpush.msra.mxu0 %v1052_v31  ;;  %1102 = vmatpush.msra.mxu1 %v1057_v25  ;;  %v1316_v12 = vmul.f32 %v1296_v42, %v1278_v40  ;;  %v1317_v52 = vmul.f32 %v1297_v39, %v1290_v37  ;;  %v1459_v24 = vperm.slane %v1978_v29, 0  ;;  %v3427_v31 = vld [vmem:[#allocation41_spill] sm:$0xff]  ;;  %v3428_v5 = vld [vmem:[#allocation52_spill] sm:$0xff]  ;;  %v1461_v20 = vperm.slane %v1978_v29, 2  ;;  %v3439_v37 = vld [vmem:[#allocation58_spill] sm:$0xff] }
 0x53f   :  { %1122 = vmatpush.msra.mxu2 %v1058_v47  ;;  %1142 = vmatpush.msra.mxu3 %v1059_v26  ;;  %v1306_v25 = vmul.f32 %v1294_v9, %v3427_v31  ;;  %v1311_v47 = vmul.f32 %v1295_v44, %v3428_v5  ;;  %v1302_v26 = vmul.f32 %v1294_v9, %v3429_v4  ;;  %v3437_v9 = vld [vmem:[#allocation20_spill] sm:$0xff]  ;;  %v3438_v40 = vld [vmem:[#allocation57_spill] sm:$0xff] }
 0x540   :  { %1084 = vmatpush.msra.mxu0 %v1048_v18  ;;  %1103 = vmatpush.msra.mxu1 %v1053_v22  ;;  %v1312_v18 = vmul.f32 %v1296_v42, %v3430_v11  ;;  %v1313_v22 = vmul.f32 %v1297_v39, %v3431_v34 }
 0x541   :  { %1123 = vmatpush.msra.mxu2 %v1054_v3  ;;  %1143 = vmatpush.msra.mxu3 %v1055_v21  ;;  %v1308_v3 = vmul.f32 %v1296_v42, %v3432_v27  ;;  %v1307_v21 = vmul.f32 %v1295_v44, %v3433_v54  ;;  %v1979_v27 = vld [vmem:[%s3312_s6 + $0x30] sm:$0xff] }
 0x542   :  { %1170 = vmatpush.msrb.mxu0 %v3410_v6  ;;  %1104 = vmatpush.msra.mxu1 %v1049_v60  ;;  %v1462_v6 = vperm.slane %v1978_v29, 3 }
 0x543   :  { %1124 = vmatpush.msra.mxu2 %v1050_v35  ;;  %1144 = vmatpush.msra.mxu3 %v1051_v59  ;;  %v3074_v13 = vpop.permute.xlu0 %1429  ;;  %v1309_v35 = vmul.f32 %v1297_v39, %v3434_v48 }
 0x544   :  { %1171 = vmatpush.msrb.mxu0 %v3411_v41  ;;  %1964 = vmatmul.msk.f32.vlgmr.msra.gmra.mxu1 %vm656_vm8, %v1962_v61  ;;  %v1414_v14 = vpop.permute.xlu1 %1413  ;;  %v3134_v58 = vpop.permute.xlu2 %1743  ;;  %v1443_v59 = vsel %vm1439_vm4, %v3074_v13, %v3063_v1  ;;  %v3435_v41 = vld [vmem:[#allocation22_spill] sm:$0xff] }
 0x545   :  { %1963 = vmatmul.msk.f32.vlgmr.msra.gmra.mxu0 %vm656_vm8, %v1962_v61  ;;  %1965 = vmatmul.msk.f32.vlgmr.msra.gmra.mxu2 %vm656_vm8, %v1962_v61  ;;  %v1455_v57 = vsel %vm1439_vm4, %v3063_v1, %v1414_v14  ;;  %v1481_v8 = vmul.f32 %v1461_v20, %v1443_v59 }
 0x546   :  { %1966 = vmatmul.msk.f32.vlgmr.msra.gmra.mxu3 %vm656_vm8, %v1962_v61  ;;  %1190 = vmatpush.msrb.mxu1 %v3412_v46  ;;  %v1303_v46 = vmul.f32 %v1295_v44, %v3435_v41 }
 0x547   :  { %1210 = vmatpush.msrb.mxu2 %v3413_v55  ;;  %1230 = vmatpush.msrb.mxu3 %v3414_v23  ;;  %v3436_v55 = vld [vmem:[#allocation21_spill] sm:$0xff] }
 0x548   :  { %1172 = vmatpush.msrb.mxu0 %v3415_v49  ;;  %1191 = vmatpush.msrb.mxu1 %v3416_v32  ;;  %v1304_v23 = vmul.f32 %v1296_v42, %v3436_v55  ;;  %v1305_v49 = vmul.f32 %v1297_v39, %v3437_v9  ;;  %v1482_v32 = vmul.f32 %v1462_v6, %v1455_v57  ;;  %v3441_v42 = vld [vmem:[#allocation62_spill] sm:$0xff]  ;;  %v3451_v57 = vld [vmem:[#allocation27_spill] sm:$0xff]  ;;  %v3455_v9 = vld [vmem:[#allocation65_spill] sm:$0xff] }
 0x549   :  { %1211 = vmatpush.msrb.mxu2 %v3417_v15  ;;  %1231 = vmatpush.msrb.mxu3 %v3418_v63  ;;  %v1973_v15 = vld [vmem:[%s3312_s6 + $0x28] sm:$0xff]  ;;  %v1984_v63 = vld [vmem:[%s3311_s7 + $0x1c] sm:$0xf]  ;;  %v1475_v39 = vmul.f32 %v1459_v24, %v3441_v42  ;;  %v3454_v55 = vld [vmem:[#allocation63_spill] sm:$0xff] }
 0x54a   :  { %1173 = vmatpush.msrb.mxu0 %v3419_v56  ;;  %1192 = vmatpush.msrb.mxu1 %v3420_v10  ;;  %v3440_v56 = vld [vmem:[#allocation10_spill] sm:$0xff]  ;;  %v1624_v11 = vperm.slane %v1984_v63, 0 }
 0x54b   :  { %1212 = vmatpush.msrb.mxu2 %v3421_v0  ;;  %1232 = vmatpush.msrb.mxu3 %v3422_v38  ;;  %v3109_v45 = vpop.permute.xlu0 %1578  ;;  %v1470_v10 = vmul.f32 %v1462_v6, %v3440_v56  ;;  %v3442_v38 = vld [vmem:[#allocation11_spill] sm:$0xff] }
 0x54c   :  { %1335 = vmatpush.msra.mxu0 %v1314_v53  ;;  %1193 = vmatpush.msrb.mxu1 %v3424_v62  ;;  %v1422_v43 = vpop.permute.xlu1 %1421  ;;  %v1478_v53 = vmul.f32 %v1462_v6, %v3439_v37  ;;  %v1467_v50 = vmul.f32 %v1459_v24, %v3442_v38  ;;  %v3460_v37 = vld [vmem:[#allocation49_spill] sm:$0xff]  ;;  %v3461_v56 = vld [vmem:[#allocation47_spill] sm:$0xff] }
 0x54d   :  { %1213 = vmatpush.msrb.mxu2 %v3425_v28  ;;  %1233 = vmatpush.msrb.mxu3 %v3426_v17  ;;  %v1451_v33 = vsel %vm1439_vm4, %v1414_v14, %v1422_v43  ;;  %v1447_v1 = vsel %vm1439_vm4, %v1422_v43, %v3074_v13  ;;  %v1460_v14 = vperm.slane %v1978_v29, 1  ;;  %v1477_v13 = vmul.f32 %v1461_v20, %v3438_v40  ;;  %v3444_v43 = vld [vmem:[#allocation44_spill] sm:$0xff]  ;;  %v3463_v38 = vld [vmem:[#allocation33_spill] sm:$0xff] }
 0x54e   :  { %1336 = vmatpush.msra.mxu0 %v1310_v51  ;;  %1355 = vmatpush.msra.mxu1 %v1315_v7  ;;  %v1479_v60 = vmul.f32 %v1459_v24, %v1451_v33  ;;  %v1626_v51 = vperm.slane %v1984_v63, 2  ;;  %v3443_v7 = vld [vmem:[#allocation39_spill] sm:$0xff]  ;;  %v3445_v28 = vld [vmem:[#allocation24_spill] sm:$0xff]  ;;  %v3447_v33 = vld [vmem:[#allocation61_spill] sm:$0xff] }
 0x54f   :  { %1375 = vmatpush.msra.mxu2 %v1316_v12  ;;  %1395 = vmatpush.msra.mxu3 %v1317_v52  ;;  %v1480_v44 = vmul.f32 %v1460_v14, %v1447_v1  ;;  %v1474_v62 = vmul.f32 %v1462_v6, %v3443_v7  ;;  %v1473_v12 = vmul.f32 %v1461_v20, %v3444_v43  ;;  %v3452_v6 = vld [vmem:[#allocation64_spill] sm:$0xff]  ;;  %v3464_v43 = vld [vmem:[#allocation59_spill] sm:$0xff] }
 0x550   :  { %1968 = vmatmul.msk.f32.vlgmr.msrb.gmra.mxu0 %vm656_vm8, %v1967_v16  ;;  %1969 = vmatmul.msk.f32.vlgmr.msrb.gmra.mxu1 %vm656_vm8, %v1967_v16  ;;  %v1469_v17 = vmul.f32 %v1461_v20, %v3445_v28  ;;  %v1476_v31 = vmul.f32 %v1460_v14, %v3447_v33  ;;  %v1642_v41 = vmul.f32 %v1626_v51, %v3452_v6  ;;  %v3453_v20 = vld [vmem:[#allocation29_spill] sm:$0xff]  ;;  %v3459_v40 = vld [vmem:[#allocation48_spill] sm:$0xff] }
 0x551   :  { %1970 = vmatmul.msk.f32.vlgmr.msrb.gmra.mxu2 %vm656_vm8, %v1967_v16  ;;  %1971 = vmatmul.msk.f32.vlgmr.msrb.gmra.mxu3 %vm656_vm8, %v1967_v16  ;;  %v3446_v16 = vld [vmem:[#allocation43_spill] sm:$0xff]  ;;  %v1985_v33 = vld [vmem:[%s3312_s6 + $0x38] sm:$0xff] }
 0x552   :  { %1337 = vmatpush.msra.mxu0 %v1306_v25  ;;  %1356 = vmatpush.msra.mxu1 %v1311_v47  ;;  %v1471_v29 = vmul.f32 %v1459_v24, %v3446_v16  ;;  %v3175_v25 = vpop.permute.xlu2 %1751  ;;  %v1625_v24 = vperm.slane %v1984_v63, 1 }
 0x553   :  { %1376 = vmatpush.msra.mxu2 %v1312_v18  ;;  %1396 = vmatpush.msra.mxu3 %v1313_v22  ;;  %v1587_v61 = vpop.permute.xlu0 %1586  ;;  %v3448_v18 = vld [vmem:[#allocation45_spill] sm:$0xff] }
 0x554   :  { %1338 = vmatpush.msra.mxu0 %v1302_v26  ;;  %1357 = vmatpush.msra.mxu1 %v1307_v21  ;;  %v1603_v30 = vpop.permute.xlu1 %1602  ;;  %v1612_v4 = vsel %vm1604_vm7, %v1587_v61, %v3090_v19  ;;  %v1616_v26 = vsel %vm1604_vm7, %v3109_v45, %v1587_v61  ;;  %v1472_v34 = vmul.f32 %v1460_v14, %v3448_v18  ;;  %v1990_v61 = vld [vmem:[%s3311_s7 + $0x20] sm:$0xf] }
 0x555   :  { %1377 = vmatpush.msra.mxu2 %v1308_v3  ;;  %1397 = vmatpush.msra.mxu3 %v1309_v35  ;;  %v1608_v0 = vsel %vm1604_vm7, %v3090_v19, %v1603_v30  ;;  %v1620_v22 = vsel %vm1604_vm7, %v1603_v30, %v3109_v45  ;;  %v1627_v3 = vperm.slane %v1984_v63, 3  ;;  %v3449_v19 = vld [vmem:[#allocation25_spill] sm:$0xff]  ;;  %v1644_v21 = vmul.f32 %v1624_v11, %v1616_v26  ;;  %v3450_v45 = vld [vmem:[#allocation26_spill] sm:$0xff]  ;;  %v3458_v63 = vld [vmem:[#allocation60_spill] sm:$0xff] }
 0x556   :  { %1358 = vmatpush.msra.mxu1 %v1303_v46  ;;  %1500 = vmatpush.msrb.mxu0 %v1479_v60  ;;  %v1646_v47 = vmul.f32 %v1626_v51, %v1608_v0  ;;  %v1468_v54 = vmul.f32 %v1460_v14, %v3449_v19  ;;  %v1645_v60 = vmul.f32 %v1625_v24, %v1612_v4  ;;  %v3456_v14 = vld [vmem:[#allocation28_spill] sm:$0xff]  ;;  %v1791_v42 = vperm.slane %v1990_v61, 2  ;;  %v3462_v0 = vld [vmem:[#allocation51_spill] sm:$0xff] }
 0x557   :  { %1378 = vmatpush.msra.mxu2 %v1304_v23  ;;  %1398 = vmatpush.msra.mxu3 %v1305_v49  ;;  %v1647_v48 = vmul.f32 %v1627_v3, %v1620_v22  ;;  %v1634_v35 = vmul.f32 %v1626_v51, %v3450_v45  ;;  %v1635_v59 = vmul.f32 %v1627_v3, %v3451_v57  ;;  %v1790_v16 = vperm.slane %v1990_v61, 1  ;;  %v3467_v4 = vld [vmem:[#allocation67_spill] sm:$0xff] }
 0x558   :  { %1974 = vmatmul.msk.f32.vlgmr.msra.gmra.mxu0 %vm656_vm8, %v1973_v15  ;;  %1975 = vmatmul.msk.f32.vlgmr.msra.gmra.mxu1 %vm656_vm8, %v1973_v15  ;;  %v1632_v30 = vmul.f32 %v1624_v11, %v3453_v20  ;;  %v1640_v23 = vmul.f32 %v1624_v11, %v3454_v55  ;;  %v1641_v49 = vmul.f32 %v1625_v24, %v3455_v9 }
 0x559   :  { %1540 = vmatpush.msrb.mxu2 %v1481_v8  ;;  %1560 = vmatpush.msrb.mxu3 %v1482_v32  ;;  %v1633_v32 = vmul.f32 %v1625_v24, %v3456_v14  ;;  %v3457_v8 = vld [vmem:[#allocation46_spill] sm:$0xff] }
 0x55a   :  { %1976 = vmatmul.msk.f32.vlgmr.msra.gmra.mxu2 %vm656_vm8, %v1973_v15  ;;  %1977 = vmatmul.msk.f32.vlgmr.msra.gmra.mxu3 %vm656_vm8, %v1973_v15  ;;  %v1638_v15 = vmul.f32 %v1626_v51, %v3457_v8  ;;  %v1789_v51 = vperm.slane %v1990_v61, 0 }
 0x55b   :  { %1541 = vmatpush.msrb.mxu2 %v1477_v13  ;;  %1561 = vmatpush.msrb.mxu3 %v1478_v53  ;;  %v3170_v52 = vpop.permute.xlu0 %1767  ;;  %v1636_v13 = vmul.f32 %v1624_v11, %v3459_v40  ;;  %v1639_v53 = vmul.f32 %v1627_v3, %v3460_v37 }
 0x55c   :  { %1520 = vmatpush.msrb.mxu1 %v1480_v44  ;;  %1501 = vmatpush.msrb.mxu0 %v1475_v39  ;;  %v1760_v5 = vpop.permute.xlu1 %1759  ;;  %v1643_v44 = vmul.f32 %v1627_v3, %v3458_v63  ;;  %v1750_v39 = vpop.permute.xlu2 %1749 }
 0x55d   :  { %1542 = vmatpush.msrb.mxu2 %v1473_v12  ;;  %1562 = vmatpush.msrb.mxu3 %v1474_v62  ;;  %v1777_v7 = vsel %vm1769_vm9, %v3175_v25, %v1760_v5  ;;  %v1773_v62 = vsel %vm1769_vm9, %v1760_v5, %v3170_v52  ;;  %v3465_v12 = vld [vmem:[#allocation66_spill] sm:$0xff]  ;;  %v1780_v26 = vsel %vm1769_vm9, %v3467_v4, %v1750_v39 }
 0x55e   :  { %1521 = vmatpush.msrb.mxu1 %v1476_v31  ;;  %1502 = vmatpush.msrb.mxu0 %v1471_v29  ;;  %v1772_v28 = vsel %vm1769_vm9, %v3465_v12, %v3464_v43  ;;  %v1785_v29 = vsel %vm1769_vm9, %v3170_v52, %v3134_v58  ;;  %v1792_v31 = vperm.slane %v1990_v61, 3  ;;  %v3466_v5 = vld [vmem:[#allocation50_spill] sm:$0xff]  ;;  %v1810_v52 = vmul.f32 %v1790_v16, %v1777_v7 }
 0x55f   :  { %1543 = vmatpush.msrb.mxu2 %v1469_v17  ;;  %1563 = vmatpush.msrb.mxu3 %v1470_v10  ;;  %v1637_v10 = vmul.f32 %v1625_v24, %v3461_v56  ;;  %v1781_v17 = vsel %vm1769_vm9, %v3134_v58, %v3175_v25  ;;  %v1776_v25 = vsel %vm1769_vm9, %v1750_v39, %v3465_v12  ;;  %v1910_v7 = vld.sshfl [vmem:[#allocation1 + $0x8] sm:$0xff pattern:$0x75316420] }
 0x560   :  { %1522 = vmatpush.msrb.mxu1 %v1472_v34  ;;  %1503 = vmatpush.msrb.mxu0 %v1467_v50  ;;  %v1771_v50 = vsel %vm1769_vm9, %v3463_v38, %v3462_v0  ;;  %v1784_v58 = vsel %vm1769_vm9, %v3464_v43, %v3467_v4  ;;  %v1811_v11 = vmul.f32 %v1791_v42, %v1773_v62  ;;  %v1911_v62 = vld.sshfl [vmem:[#allocation1 + $0x10] sm:$0xff pattern:$0x75316420] }
 0x561   :  { %1980 = vmatmul.msk.f32.vlgmr.msrb.gmra.mxu0 %vm656_vm8, %v1979_v27  ;;  %1705 = vmatpush.msra.mxu2 %v1646_v47  ;;  %v1783_v47 = vsel %vm1769_vm9, %v3462_v0, %v3466_v5  ;;  %v1807_v24 = vmul.f32 %v1791_v42, %v1772_v28  ;;  %v1809_v18 = vmul.f32 %v1789_v51, %v1781_v17  ;;  %v1912_v28 = vld.sshfl [vmem:[#allocation1 + $0x18] sm:$0xff pattern:$0x75316420] }
 0x562   :  { %1523 = vmatpush.msrb.mxu1 %v1468_v54  ;;  %1982 = vmatmul.msk.f32.vlgmr.msrb.gmra.mxu2 %vm656_vm8, %v1979_v27  ;;  %v1812_v34 = vmul.f32 %v1792_v31, %v1785_v29  ;;  %v1806_v3 = vmul.f32 %v1790_v16, %v1776_v25  ;;  %v1803_v6 = vmul.f32 %v1791_v42, %v1771_v50 }
 0x563   :  { %1981 = vmatmul.msk.f32.vlgmr.msrb.gmra.mxu1 %vm656_vm8, %v1979_v27  ;;  %1983 = vmatmul.msk.f32.vlgmr.msrb.gmra.mxu3 %vm656_vm8, %v1979_v27  ;;  %v1762_v46 = vpop.permute.xlu0 %1761  ;;  %v1805_v27 = vmul.f32 %v1789_v51, %v1780_v26  ;;  %1918 = vst [vmem:[%s3313_s8 + $0x28] sm:$0xf] %v1910_v7 }
 0x564   :  { %1665 = vmatpush.msra.mxu0 %v1644_v21  ;;  %1685 = vmatpush.msra.mxu1 %v1645_v60  ;;  %v3205_v1 = vpop.permute.xlu1 %1753  ;;  %v1782_v19 = vsel %vm1769_vm9, %v1762_v46, %v2977_v36  ;;  %1919 = vst [vmem:[%s3313_s8 + $0x30] sm:$0xf] %v1911_v62 }
 0x565   :  { %1725 = vmatpush.msra.mxu3 %v1647_v48  ;;  %1706 = vmatpush.msra.mxu2 %v1642_v41  ;;  %v1770_v21 = vsel %vm1769_vm9, %v3205_v1, %v1762_v46  ;;  %v1804_v46 = vmul.f32 %v1792_v31, %v1783_v47  ;;  %v1800_v20 = vmul.f32 %v1792_v31, %v1782_v19 }
 0x566   :  { %1666 = vmatpush.msra.mxu0 %v1640_v23  ;;  %1686 = vmatpush.msra.mxu1 %v1641_v49  ;;  %v1799_v41 = vmul.f32 %v1791_v42, %v1770_v21  ;;  %1920 = vst [vmem:[%s3313_s8 + $0x38] sm:$0xf] %v1912_v28 }
 0x567   :  { %1726 = vmatpush.msra.mxu3 %v1643_v44  ;;  %1707 = vmatpush.msra.mxu2 %v1638_v15 }
 0x568   :  { %1667 = vmatpush.msra.mxu0 %v1636_v13  ;;  %1687 = vmatpush.msra.mxu1 %v1637_v10 }
 0x569   :  { %1727 = vmatpush.msra.mxu3 %v1639_v53  ;;  %1708 = vmatpush.msra.mxu2 %v1634_v35 }
 0x56a   :  { %1668 = vmatpush.msra.mxu0 %v1632_v30  ;;  %1688 = vmatpush.msra.mxu1 %v1633_v32 }
 0x56b   :  { %1728 = vmatpush.msra.mxu3 %v1635_v59  ;;  %1986 = vmatmul.msk.f32.vlgmr.msra.gmra.mxu0 %vm656_vm8, %v1985_v33  ;;  %v1746_v22 = vpop.permute.xlu0 %1745  ;;  %v1808_v59 = vmul.f32 %v1792_v31, %v1784_v58 }
 0x56c   :  { %1987 = vmatmul.msk.f32.vlgmr.msra.gmra.mxu1 %vm656_vm8, %v1985_v33  ;;  %1988 = vmatmul.msk.f32.vlgmr.msra.gmra.mxu2 %vm656_vm8, %v1985_v33  ;;  %v1748_v54 = vpop.permute.xlu1 %1747  ;;  %v1778_v57 = vsel %vm1769_vm9, %v2977_v36, %v1746_v22  ;;  %v1774_v61 = vsel %vm1769_vm9, %v1746_v22, %v3205_v1  ;;  %v1991_v36 = vld [vmem:[%s3312_s6 + $0x40] sm:$0xff] }
 0x56d   :  { %1989 = vmatmul.msk.f32.vlgmr.msra.gmra.mxu3 %vm656_vm8, %v1985_v33  ;;  %1830 = vmatpush.msrb.mxu0 %v1809_v18  ;;  %v1775_v60 = vsel %vm1769_vm9, %v1748_v54, %v3463_v38  ;;  %v1779_v48 = vsel %vm1769_vm9, %v3466_v5, %v1748_v54  ;;  %v1797_v30 = vmul.f32 %v1789_v51, %v1778_v57 }
 0x56e   :  { %1850 = vmatpush.msrb.mxu1 %v1810_v52  ;;  %1870 = vmatpush.msrb.mxu2 %v1811_v11  ;;  %v1801_v45 = vmul.f32 %v1789_v51, %v1779_v48  ;;  %v1802_v35 = vmul.f32 %v1790_v16, %v1775_v60  ;;  %v1798_v55 = vmul.f32 %v1790_v16, %v1774_v61  ;;  %v1909_v51 = vld.sshfl [vmem:[#allocation1] sm:$0xff pattern:$0x75316420] }
 0x56f   :  { %1890 = vmatpush.msrb.mxu3 %v1812_v34  ;;  %1831 = vmatpush.msrb.mxu0 %v1805_v27  ;;  %1917 = vst [vmem:[%s3313_s8 + $0x20] sm:$0xf] %v1909_v51 }
 0x570   :  { %1851 = vmatpush.msrb.mxu1 %v1806_v3  ;;  %1871 = vmatpush.msrb.mxu2 %v1807_v24 }
 0x571   :  { %1891 = vmatpush.msrb.mxu3 %v1808_v59  ;;  %1832 = vmatpush.msrb.mxu0 %v1801_v45 }
 0x572   :  { %1872 = vmatpush.msrb.mxu2 %v1803_v6  ;;  %1852 = vmatpush.msrb.mxu1 %v1802_v35 }
 0x573   :  { %1892 = vmatpush.msrb.mxu3 %v1804_v46  ;;  %1833 = vmatpush.msrb.mxu0 %v1797_v30 }
 0x574   :  { %1873 = vmatpush.msrb.mxu2 %v1799_v41  ;;  %1853 = vmatpush.msrb.mxu1 %v1798_v55 }
 0x575   :  { %1893 = vmatpush.msrb.mxu3 %v1800_v20  ;;  %1994 = vmatmul.msk.f32.vlgmr.msrb.gmra.mxu2 %vm656_vm8, %v1991_v36 }
 0x576   :  { %1995 = vmatmul.msk.f32.vlgmr.msrb.gmra.mxu3 %vm656_vm8, %v1991_v36  ;;  %1992 = vmatmul.msk.f32.vlgmr.msrb.gmra.mxu0 %vm656_vm8, %v1991_v36 }
 0x577   :  { %1993 = vmatmul.msk.f32.vlgmr.msrb.gmra.mxu1 %vm656_vm8, %v1991_v36 }
 0x59b   :  { %v697_v23 = vpop.f32.mrf.mxu1 }
 0x5a4   :  { %v677_v2 = vpop.f32.mrf.mxu0 }
 0x5aa   :  { %v717_v9 = vpop.f32.mrf.mxu2 }
 0x5ab   :  { %v737_v49 = vpop.f32.mrf.mxu3 }
 0x5ae   :  { %v760_v1 = vpop.f32.mrf.mxu0  ;;  %v780_v14 = vpop.f32.mrf.mxu1 }
 0x5af   :  { %v781_v29 = vadd.f32 %v780_v14, %v697_v23  ;;  %v761_v33 = vadd.f32 %v760_v1, %v677_v2 }
 0x5b5   :  { %v800_v32 = vpop.f32.mrf.mxu2  ;;  %v820_v8 = vpop.f32.mrf.mxu3 }
 0x5b6   :  { %v801_v26 = vadd.f32 %v800_v32, %v717_v9  ;;  %v821_v11 = vadd.f32 %v820_v8, %v737_v49 }
 0x5b7   :  { %v921_v15 = vpop.f32.mrf.mxu0 }
 0x5b8   :  { %v941_v63 = vpop.f32.mrf.mxu1  ;;  %v984_v47 = vadd.f32 %v921_v15, %v761_v33 }
 0x5b9   :  { %v985_v25 = vadd.f32 %v941_v63, %v781_v29 }
 0x5be   :  { %v961_v44 = vpop.f32.mrf.mxu2 }
 0x5bf   :  { %v981_v40 = vpop.f32.mrf.mxu3  ;;  %v986_v34 = vadd.f32 %v961_v44, %v801_v26 }
 0x5c0   :  { %v987_v27 = vadd.f32 %v981_v40, %v821_v11 }
 0x5c1   :  { %v1106_v37 = vpop.f32.mrf.mxu1 }
 0x5c2   :  { %v1086_v13 = vpop.f32.mrf.mxu0  ;;  %v1150_v58 = vadd.f32 %v1106_v37, %v985_v25 }
 0x5c3   :  { %v1149_v4 = vadd.f32 %v1086_v13, %v984_v47 }
 0x5c8   :  { %v1126_v53 = vpop.f32.mrf.mxu2 }
 0x5c9   :  { %v1146_v56 = vpop.f32.mrf.mxu3  ;;  %v1151_v19 = vadd.f32 %v1126_v53, %v986_v34 }
 0x5ca   :  { %v1152_v21 = vadd.f32 %v1146_v56, %v987_v27 }
 0x5cd   :  { %v1175_v10 = vpop.f32.mrf.mxu0  ;;  %v1195_v42 = vpop.f32.mrf.mxu1 }
 0x5ce   :  { %v1238_v24 = vadd.f32 %v1175_v10, %v1149_v4  ;;  %v1239_v22 = vadd.f32 %v1195_v42, %v1150_v58 }
 0x5d4   :  { %v1215_v39 = vpop.f32.mrf.mxu2  ;;  %v1235_v0 = vpop.f32.mrf.mxu3 }
 0x5d5   :  { %v1340_v38 = vpop.f32.mrf.mxu0  ;;  %v1360_v50 = vpop.f32.mrf.mxu1  ;;  %v1240_v45 = vadd.f32 %v1215_v39, %v1151_v19  ;;  %v1241_v59 = vadd.f32 %v1235_v0, %v1152_v21 }
 0x5d6   :  { %v1403_v3 = vadd.f32 %v1340_v38, %v1238_v24  ;;  %v1404_v54 = vadd.f32 %v1360_v50, %v1239_v22 }
 0x5dd   :  { %v1380_v43 = vpop.f32.mrf.mxu2  ;;  %v1400_v12 = vpop.f32.mrf.mxu3 }
 0x5de   :  { %v1505_v17 = vpop.f32.mrf.mxu0  ;;  %v1405_v6 = vadd.f32 %v1380_v43, %v1240_v45  ;;  %v1406_v20 = vadd.f32 %v1400_v12, %v1241_v59 }
 0x5df   :  { %v1568_v60 = vadd.f32 %v1505_v17, %v1403_v3 }
 0x5e0   :  { %v1525_v16 = vpop.f32.mrf.mxu1 }
 0x5e1   :  { %v1569_v35 = vadd.f32 %v1525_v16, %v1404_v54 }
 0x5e5   :  { %v1545_v31 = vpop.f32.mrf.mxu2 }
 0x5e6   :  { %v1565_v5 = vpop.f32.mrf.mxu3  ;;  %v1570_v55 = vadd.f32 %v1545_v31, %v1405_v6 }
 0x5e7   :  { %v1571_v23 = vadd.f32 %v1565_v5, %v1406_v20 }
 0x5e8   :  { %v1670_v52 = vpop.f32.mrf.mxu0 }
 0x5e9   :  { %v1690_v18 = vpop.f32.mrf.mxu1  ;;  %v1733_v61 = vadd.f32 %v1670_v52, %v1568_v60 }
 0x5ea   :  { %v1734_v41 = vadd.f32 %v1690_v18, %v1569_v35 }
 0x5ef   :  { %v1710_v48 = vpop.f32.mrf.mxu2 }
 0x5f0   :  { %v1730_v57 = vpop.f32.mrf.mxu3  ;;  %v1735_v9 = vadd.f32 %v1710_v48, %v1570_v55 }
 0x5f1   :  { %v1736_v49 = vadd.f32 %v1730_v57, %v1571_v23 }
 0x5f3   :  { %v1835_v46 = vpop.f32.mrf.mxu0 }
 0x5f4   :  { %v1898_v30 = vadd.f32 %v1835_v46, %v1733_v61  ;;  %v1855_v36 = vpop.f32.mrf.mxu1 }
 0x5f5   :  { %v1899_v2 = vadd.f32 %v1855_v36, %v1734_v41 }
 0x5f6   :  { %1902 = vst [vmem:[%s3313_s8] sm:$0xff] %v1898_v30 }
 0x5f7   :  { %1903 = vst [vmem:[%s3313_s8 + $0x8] sm:$0xff] %v1899_v2 }
 0x5f8   :  { %v1875_v1 = vpop.f32.mrf.mxu2 }
 0x5f9   :  { %v1900_v14 = vadd.f32 %v1875_v1, %v1735_v9  ;;  %v1895_v32 = vpop.f32.mrf.mxu3 }
 0x5fa   :  { %v1901_v8 = vadd.f32 %v1895_v32, %v1736_v49 }
 0x5fb   :  { %1904 = vst [vmem:[%s3313_s8 + $0x10] sm:$0xff] %v1900_v14 }
 0x5fc   :  { %1905 = vst [vmem:[%s3313_s8 + $0x18] sm:$0xff] %v1901_v8 }

</bundles_post_ra>
